<compile_context>
chip_gen: v7x
topology: tpu7x:2x2x1
jax: 0.10.0
libtpu: 0.0.40
codegen_flags: <defaults>
</compile_context>

<pallas_src>
import math

import jax
import jax.numpy as jnp
from jax.experimental import pallas as pl
from jax.experimental.pallas import tpu as pltpu

# ---------------- small, module-consistent configuration -------------------
BATCH = 2
SEQ = 8           # input_shape[1]
F1, F2 = 4, 2     # input_shape[2], input_shape[3]
FEATURES = F1 * F2
EMBED = 32
HEADS = 4
HEAD_DIM = EMBED // HEADS
LAYERS = 2
OUT_DIM = 14
LN_EPS = 1e-5


# ------------------------------ fused kernel --------------------------------
def _forward_kernel(
        x_ref, in_w_ref, in_b_ref, pos_ref,
        wq_ref, wk_ref, wv_ref, bq_ref, bk_ref, bv_ref,
        wo_ref, bo_ref, ln1g_ref, ln1b_ref, ln2g_ref, ln2b_ref,
        ff1w_ref, ff1b_ref, ff2w_ref, ff2b_ref,
        ghead_ref, gheadt_ref, hsel_ref, bsel_ref,
        h1w_ref, h1b_ref, h2w_ref, h2b_ref,
        out_ref):
    f32 = jnp.float32

    def dot(a, b):
        return jnp.dot(a, b, preferred_element_type=f32)

    def layernorm(x, g, b):
        mean = jnp.mean(x, axis=-1, keepdims=True)
        cen = x - mean
        var = jnp.mean(cen * cen, axis=-1, keepdims=True)
        return cen * jax.lax.rsqrt(var + LN_EPS) * g + b

    # ---- input projection + positional encoding: h is (B*SEQ, EMBED) -------
    h = dot(x_ref[...], in_w_ref[...]) + in_b_ref[...] + pos_ref[...]

    ghead = ghead_ref[...]        # (EMBED, HEADS)  one-hot head membership
    gheadt = gheadt_ref[...]      # (HEADS, EMBED)
    scale = 1.0 / math.sqrt(HEAD_DIM)

    # ---- transformer blocks (statically unrolled, weights VMEM-resident) ---
    for i in range(LAYERS):
        q = dot(h, wq_ref[i]) + bq_ref[i]
        k = dot(h, wk_ref[i]) + bk_ref[i]
        v = dot(h, wv_ref[i]) + bv_ref[i]

        # nn.MultiheadAttention with batch_first=False: attention runs over
        # the batch axis (length B) with (seq, head) as the attention batch.
        # Head-wise reductions/broadcasts are matmuls against `ghead`, so no
        # in-kernel transposes or reshapes are needed.
        outs = []
        for l in range(BATCH):
            q_l = q[l * SEQ:(l + 1) * SEQ, :] * scale          # (SEQ, EMBED)
            scores = []
            for m in range(BATCH):
                k_m = k[m * SEQ:(m + 1) * SEQ, :]
                scores.append(dot(q_l * k_m, ghead))           # (SEQ, HEADS)
            mx = scores[0]
            for sc in scores[1:]:
                mx = jnp.maximum(mx, sc)
            exps = [jnp.exp(sc - mx) for sc in scores]
            den = exps[0]
            for ex in exps[1:]:
                den = den + ex
            o_l = jnp.zeros((SEQ, EMBED), f32)
            for m in range(BATCH):
                w = exps[m] / den                              # (SEQ, HEADS)
                o_l = o_l + dot(w, gheadt) * v[m * SEQ:(m + 1) * SEQ, :]
            outs.append(o_l)
        attn = jnp.concatenate(outs, axis=0)                   # (B*SEQ, EMBED)
        attn = dot(attn, wo_ref[i]) + bo_ref[i]

        h = layernorm(h + attn, ln1g_ref[i], ln1b_ref[i])
        ff = jnp.maximum(dot(h, ff1w_ref[i]) + ff1b_ref[i], 0.0)
        ff = dot(ff, ff2w_ref[i]) + ff2b_ref[i]
        h = layernorm(h + ff, ln2g_ref[i], ln2b_ref[i])

    # ---- output head: == relu(reshape(h,(B,SEQ*E)) @ W1 + b1) @ W2 + b2 ----
    # The (B*SEQ, E) -> (B, SEQ*E) reshape is expressed with one-hot selector
    # matmuls (hsel / bsel) to stay MXU/VPU friendly inside the kernel.
    hsel = hsel_ref[...]                                       # (B*SEQ, SEQ)
    t = jnp.zeros((BATCH * SEQ, EMBED), f32)
    for s in range(SEQ):
        t = t + hsel[:, s:s + 1] * dot(h, h1w_ref[s])
    y = jnp.maximum(dot(bsel_ref[...], t) + h1b_ref[...], 0.0)  # (B, EMBED)
    y = dot(y, h2w_ref[...]) + h2b_ref[...]                     # (B, OUT_DIM)
    out_ref[...] = y.astype(out_ref.dtype)


# ------------------------------ parameters ----------------------------------
def _dense_params(key, fan_in, fan_out):
    kw, kb = jax.random.split(key)
    bound = 1.0 / math.sqrt(fan_in)
    w = jax.random.uniform(kw, (fan_out, fan_in), minval=-bound, maxval=bound,
                           dtype=jnp.float32)
    b = jax.random.uniform(kb, (fan_out,), minval=-bound, maxval=bound,
                           dtype=jnp.float32)
    return w.T, b  # stored as (in, out) for the kernel


def init_params(key):
    keys = iter(jax.random.split(key, 4 + LAYERS * 4))
    p = {}
    in_w_t, in_b = _dense_params(next(keys), FEATURES, EMBED)
    p["in_w_t"] = in_w_t
    p["in_b"] = in_b.reshape(1, EMBED)
    p["pos"] = jax.random.normal(next(keys), (1, SEQ, EMBED), dtype=jnp.float32)

    wq, wk, wv, bq, bk, bv = [], [], [], [], [], []
    wo, bo = [], []
    ln1g, ln1b, ln2g, ln2b = [], [], [], []
    ff1w, ff1b, ff2w, ff2b = [], [], [], []
    for _ in range(LAYERS):
        qkv_w_t, qkv_b = _dense_params(next(keys), EMBED, 3 * EMBED)
        wq.append(qkv_w_t[:, 0 * EMBED:1 * EMBED])
        wk.append(qkv_w_t[:, 1 * EMBED:2 * EMBED])
        wv.append(qkv_w_t[:, 2 * EMBED:3 * EMBED])
        bq.append(qkv_b[0 * EMBED:1 * EMBED].reshape(1, EMBED))
        bk.append(qkv_b[1 * EMBED:2 * EMBED].reshape(1, EMBED))
        bv.append(qkv_b[2 * EMBED:3 * EMBED].reshape(1, EMBED))
        out_w_t, out_b = _dense_params(next(keys), EMBED, EMBED)
        wo.append(out_w_t)
        bo.append(out_b.reshape(1, EMBED))
        ln1g.append(jnp.ones((1, EMBED), jnp.float32))
        ln1b.append(jnp.zeros((1, EMBED), jnp.float32))
        ln2g.append(jnp.ones((1, EMBED), jnp.float32))
        ln2b.append(jnp.zeros((1, EMBED), jnp.float32))
        f1w, f1b = _dense_params(next(keys), EMBED, 4 * EMBED)
        f2w, f2b = _dense_params(next(keys), 4 * EMBED, EMBED)
        ff1w.append(f1w)
        ff1b.append(f1b.reshape(1, 4 * EMBED))
        ff2w.append(f2w)
        ff2b.append(f2b.reshape(1, EMBED))

    p["wq"], p["wk"], p["wv"] = jnp.stack(wq), jnp.stack(wk), jnp.stack(wv)
    p["bq"], p["bk"], p["bv"] = jnp.stack(bq), jnp.stack(bk), jnp.stack(bv)
    p["wo"], p["bo"] = jnp.stack(wo), jnp.stack(bo)
    p["ln1g"], p["ln1b"] = jnp.stack(ln1g), jnp.stack(ln1b)
    p["ln2g"], p["ln2b"] = jnp.stack(ln2g), jnp.stack(ln2b)
    p["ff1w"], p["ff1b"] = jnp.stack(ff1w), jnp.stack(ff1b)
    p["ff2w"], p["ff2b"] = jnp.stack(ff2w), jnp.stack(ff2b)

    h1w_t, h1b = _dense_params(next(keys), EMBED * SEQ, EMBED)
    p["h1w"] = h1w_t.reshape(SEQ, EMBED, EMBED)   # [s, e, o] == W1[s*E+e, o]
    p["h1b"] = h1b.reshape(1, EMBED)
    h2w_t, h2b = _dense_params(next(keys), EMBED, OUT_DIM)
    p["h2w"] = h2w_t
    p["h2b"] = h2b.reshape(1, OUT_DIM)

    # constant one-hot selector matrices (head grouping / flatten selectors)
    e_ids = jnp.arange(EMBED)
    p["ghead"] = (e_ids[:, None] // HEAD_DIM
                  == jnp.arange(HEADS)[None, :]).astype(jnp.float32)
    p["ghead_t"] = p["ghead"].T
    r_ids = jnp.arange(BATCH * SEQ)
    p["head_sel"] = (r_ids[:, None] % SEQ
                     == jnp.arange(SEQ)[None, :]).astype(jnp.float32)
    p["batch_sel"] = (r_ids[None, :] // SEQ
                      == jnp.arange(BATCH)[:, None]).astype(jnp.float32)
    return p


# ------------------------------ forward pass --------------------------------
@jax.jit
def transformer_forward(params, x):
    B = x.shape[0]
    assert B == BATCH
    x_flat = x.reshape(B * SEQ, FEATURES).astype(jnp.float32)
    pos_tiled = jnp.tile(params["pos"][0], (B, 1))            # (B*SEQ, EMBED)

    inputs = (
        x_flat, params["in_w_t"], params["in_b"], pos_tiled,
        params["wq"], params["wk"], params["wv"],
        params["bq"], params["bk"], params["bv"],
        params["wo"], params["bo"],
        params["ln1g"], params["ln1b"], params["ln2g"], params["ln2b"],
        params["ff1w"], params["ff1b"], params["ff2w"], params["ff2b"],
        params["ghead"], params["ghead_t"], params["head_sel"], params["batch_sel"],
        params["h1w"], params["h1b"], params["h2w"], params["h2b"],
    )
    vmem = pl.BlockSpec(memory_space=pltpu.MemorySpace.VMEM)
    return pl.pallas_call(
        _forward_kernel,
        out_shape=jax.ShapeDtypeStruct((B, OUT_DIM), jnp.float32),
        in_specs=[vmem] * len(inputs),
        out_specs=vmem,
    )(*inputs)


# ------------------------- pure-JAX reference (check) ------------------------
def _ln_ref(x, g, b):
    mean = jnp.mean(x, axis=-1, keepdims=True)
    var = jnp.mean((x - mean) ** 2, axis=-1, keepdims=True)
    return (x - mean) * jax.lax.rsqrt(var + LN_EPS) * g + b


def reference_forward(params, x):
    hp = jax.lax.Precision.HIGHEST
    B = x.shape[0]
    h = x.reshape(B, SEQ, FEATURES)
    h = jnp.einsum("bsf,fe->bse", h, params["in_w_t"], precision=hp) + params["in_b"][0]
    h = h + params["pos"]
    for i in range(LAYERS):
        q = jnp.einsum("bse,ef->bsf", h, params["wq"][i], precision=hp) + params["bq"][i][0]
        k = jnp.einsum("bse,ef->bsf", h, params["wk"][i], precision=hp) + params["bk"][i][0]
        v = jnp.einsum("bse,ef->bsf", h, params["wv"][i], precision=hp) + params["bv"][i][0]

        def to_heads(t):  # (B, S, E) -> (S*H, B, hd), batch_first=False semantics
            return jnp.transpose(t.reshape(B, SEQ * HEADS, HEAD_DIM), (1, 0, 2))

        qh, kh, vh = to_heads(q), to_heads(k), to_heads(v)
        s = jnp.einsum("nld,nmd->nlm", qh, kh, precision=hp) / math.sqrt(HEAD_DIM)
        pw = jax.nn.softmax(s, axis=-1)
        o = jnp.einsum("nlm,nmd->nld", pw, vh, precision=hp)
        attn = jnp.transpose(o, (1, 0, 2)).reshape(B, SEQ, EMBED)
        attn = jnp.einsum("bse,ef->bsf", attn, params["wo"][i], precision=hp) + params["bo"][i][0]
        h = _ln_ref(h + attn, params["ln1g"][i][0], params["ln1b"][i][0])
        ff = jax.nn.relu(jnp.einsum("bse,ef->bsf", h, params["ff1w"][i], precision=hp)
                         + params["ff1b"][i][0])
        ff = jnp.einsum("bsf,fe->bse", ff, params["ff2w"][i], precision=hp) + params["ff2b"][i][0]
        h = _ln_ref(h + ff, params["ln2g"][i][0], params["ln2b"][i][0])
    hflat = h.reshape(B, SEQ * EMBED)
    w1 = params["h1w"].reshape(SEQ * EMBED, EMBED)
    y = jax.nn.relu(jnp.dot(hflat, w1, precision=hp) + params["h1b"][0])
    y = jnp.dot(y, params["h2w"], precision=hp) + params["h2b"][0]
    return y


# --------------------------------- main --------------------------------------
if __name__ == "__main__":
    key = jax.random.PRNGKey(0)
    pkey, xkey = jax.random.split(key)
    params = init_params(pkey)
    x = jax.random.normal(xkey, (BATCH, SEQ, F1, F2), dtype=jnp.float32)

    out = transformer_forward(params, x)
    out = jax.block_until_ready(out)
    assert out.shape == (BATCH, OUT_DIM), out.shape
    assert bool(jnp.all(jnp.isfinite(out)))

    ref = reference_forward(params, x)
    err = float(jnp.max(jnp.abs(out - ref)))
    assert err < 2e-2, f"mismatch vs pure-JAX reference: max abs err = {err}"

    print("KERNEL_OK")
</pallas_src>

<mosaic_0001>
module attributes {stable_mosaic.version = 11 : i64} {
  func.func @_forward_kernel(%arg0: memref<16x8xf32, #tpu.memory_space<vmem>>, %arg1: memref<8x32xf32, #tpu.memory_space<vmem>>, %arg2: memref<1x32xf32, #tpu.memory_space<vmem>>, %arg3: memref<16x32xf32, #tpu.memory_space<vmem>>, %arg4: memref<2x32x32xf32, #tpu.memory_space<vmem>>, %arg5: memref<2x32x32xf32, #tpu.memory_space<vmem>>, %arg6: memref<2x32x32xf32, #tpu.memory_space<vmem>>, %arg7: memref<2x1x32xf32, #tpu.memory_space<vmem>>, %arg8: memref<2x1x32xf32, #tpu.memory_space<vmem>>, %arg9: memref<2x1x32xf32, #tpu.memory_space<vmem>>, %arg10: memref<2x32x32xf32, #tpu.memory_space<vmem>>, %arg11: memref<2x1x32xf32, #tpu.memory_space<vmem>>, %arg12: memref<2x1x32xf32, #tpu.memory_space<vmem>>, %arg13: memref<2x1x32xf32, #tpu.memory_space<vmem>>, %arg14: memref<2x1x32xf32, #tpu.memory_space<vmem>>, %arg15: memref<2x1x32xf32, #tpu.memory_space<vmem>>, %arg16: memref<2x32x128xf32, #tpu.memory_space<vmem>>, %arg17: memref<2x1x128xf32, #tpu.memory_space<vmem>>, %arg18: memref<2x128x32xf32, #tpu.memory_space<vmem>>, %arg19: memref<2x1x32xf32, #tpu.memory_space<vmem>>, %arg20: memref<32x4xf32, #tpu.memory_space<vmem>>, %arg21: memref<4x32xf32, #tpu.memory_space<vmem>>, %arg22: memref<16x8xf32, #tpu.memory_space<vmem>>, %arg23: memref<2x16xf32, #tpu.memory_space<vmem>>, %arg24: memref<8x32x32xf32, #tpu.memory_space<vmem>>, %arg25: memref<1x32xf32, #tpu.memory_space<vmem>>, %arg26: memref<32x14xf32, #tpu.memory_space<vmem>>, %arg27: memref<1x14xf32, #tpu.memory_space<vmem>>, %arg28: memref<2x14xf32, #tpu.memory_space<vmem>>) attributes {dimension_semantics = [], scalar_prefetch = 0 : i64, scratch_operands = 0 : i64, tpu.core_type = #tpu.core_type<tc>} {
    %c0 = arith.constant 0 : index
    %c0_0 = arith.constant 0 : index
    %0 = vector.load %arg0[%c0, %c0_0] : memref<16x8xf32, #tpu.memory_space<vmem>>, vector<16x8xf32>
    %c0_1 = arith.constant 0 : index
    %c0_2 = arith.constant 0 : index
    %1 = vector.load %arg1[%c0_1, %c0_2] : memref<8x32xf32, #tpu.memory_space<vmem>>, vector<8x32xf32>
    %cst = arith.constant dense<0.000000e+00> : vector<16x32xf32>
    %2 = tpu.matmul %0, %1, %cst {dimension_numbers = #tpu.dot_dimension_numbers<[1], [0], [0], [1], [0, 0, 1, 1], [], []>} : vector<16x8xf32>, vector<8x32xf32>, vector<16x32xf32> -> vector<16x32xf32>
    %c0_3 = arith.constant 0 : index
    %c0_4 = arith.constant 0 : index
    %3 = vector.load %arg2[%c0_3, %c0_4] : memref<1x32xf32, #tpu.memory_space<vmem>>, vector<1x32xf32>
    %4 = vector.broadcast %3 : vector<1x32xf32> to vector<16x32xf32>
    %5 = arith.addf %2, %4 : vector<16x32xf32>
    %c0_5 = arith.constant 0 : index
    %c0_6 = arith.constant 0 : index
    %6 = vector.load %arg3[%c0_5, %c0_6] : memref<16x32xf32, #tpu.memory_space<vmem>>, vector<16x32xf32>
    %7 = arith.addf %5, %6 : vector<16x32xf32>
    %c0_7 = arith.constant 0 : index
    %c0_8 = arith.constant 0 : index
    %8 = vector.load %arg20[%c0_7, %c0_8] : memref<32x4xf32, #tpu.memory_space<vmem>>, vector<32x4xf32>
    %c0_9 = arith.constant 0 : index
    %c0_10 = arith.constant 0 : index
    %9 = vector.load %arg21[%c0_9, %c0_10] : memref<4x32xf32, #tpu.memory_space<vmem>>, vector<4x32xf32>
    %c0_11 = arith.constant 0 : index
    %c0_12 = arith.constant 0 : index
    %c0_13 = arith.constant 0 : index
    %10 = vector.load %arg4[%c0_11, %c0_12, %c0_13] : memref<2x32x32xf32, #tpu.memory_space<vmem>>, vector<1x32x32xf32>
    %11 = vector.shape_cast %10 : vector<1x32x32xf32> to vector<32x32xf32>
    %cst_14 = arith.constant dense<0.000000e+00> : vector<16x32xf32>
    %12 = tpu.matmul %7, %11, %cst_14 {dimension_numbers = #tpu.dot_dimension_numbers<[1], [0], [0], [1], [0, 0, 1, 1], [], []>} : vector<16x32xf32>, vector<32x32xf32>, vector<16x32xf32> -> vector<16x32xf32>
    %c0_15 = arith.constant 0 : index
    %c0_16 = arith.constant 0 : index
    %c0_17 = arith.constant 0 : index
    %13 = vector.load %arg7[%c0_15, %c0_16, %c0_17] : memref<2x1x32xf32, #tpu.memory_space<vmem>>, vector<1x1x32xf32>
    %14 = vector.shape_cast %13 : vector<1x1x32xf32> to vector<1x32xf32>
    %15 = vector.broadcast %14 : vector<1x32xf32> to vector<16x32xf32>
    %16 = arith.addf %12, %15 : vector<16x32xf32>
    %c0_18 = arith.constant 0 : index
    %c0_19 = arith.constant 0 : index
    %c0_20 = arith.constant 0 : index
    %17 = vector.load %arg5[%c0_18, %c0_19, %c0_20] : memref<2x32x32xf32, #tpu.memory_space<vmem>>, vector<1x32x32xf32>
    %18 = vector.shape_cast %17 : vector<1x32x32xf32> to vector<32x32xf32>
    %cst_21 = arith.constant dense<0.000000e+00> : vector<16x32xf32>
    %19 = tpu.matmul %7, %18, %cst_21 {dimension_numbers = #tpu.dot_dimension_numbers<[1], [0], [0], [1], [0, 0, 1, 1], [], []>} : vector<16x32xf32>, vector<32x32xf32>, vector<16x32xf32> -> vector<16x32xf32>
    %c0_22 = arith.constant 0 : index
    %c0_23 = arith.constant 0 : index
    %c0_24 = arith.constant 0 : index
    %20 = vector.load %arg8[%c0_22, %c0_23, %c0_24] : memref<2x1x32xf32, #tpu.memory_space<vmem>>, vector<1x1x32xf32>
    %21 = vector.shape_cast %20 : vector<1x1x32xf32> to vector<1x32xf32>
    %22 = vector.broadcast %21 : vector<1x32xf32> to vector<16x32xf32>
    %23 = arith.addf %19, %22 : vector<16x32xf32>
    %c0_25 = arith.constant 0 : index
    %c0_26 = arith.constant 0 : index
    %c0_27 = arith.constant 0 : index
    %24 = vector.load %arg6[%c0_25, %c0_26, %c0_27] : memref<2x32x32xf32, #tpu.memory_space<vmem>>, vector<1x32x32xf32>
    %25 = vector.shape_cast %24 : vector<1x32x32xf32> to vector<32x32xf32>
    %cst_28 = arith.constant dense<0.000000e+00> : vector<16x32xf32>
    %26 = tpu.matmul %7, %25, %cst_28 {dimension_numbers = #tpu.dot_dimension_numbers<[1], [0], [0], [1], [0, 0, 1, 1], [], []>} : vector<16x32xf32>, vector<32x32xf32>, vector<16x32xf32> -> vector<16x32xf32>
    %c0_29 = arith.constant 0 : index
    %c0_30 = arith.constant 0 : index
    %c0_31 = arith.constant 0 : index
    %27 = vector.load %arg9[%c0_29, %c0_30, %c0_31] : memref<2x1x32xf32, #tpu.memory_space<vmem>>, vector<1x1x32xf32>
    %28 = vector.shape_cast %27 : vector<1x1x32xf32> to vector<1x32xf32>
    %29 = vector.broadcast %28 : vector<1x32xf32> to vector<16x32xf32>
    %30 = arith.addf %26, %29 : vector<16x32xf32>
    %31 = vector.extract_strided_slice %16 {offsets = [0, 0], sizes = [8, 32], strides = [1, 1]} : vector<16x32xf32> to vector<8x32xf32>
    %cst_32 = arith.constant 0.353553385 : f32
    %32 = vector.broadcast %cst_32 : f32 to vector<8x32xf32>
    %33 = arith.mulf %31, %32 : vector<8x32xf32>
    %34 = vector.extract_strided_slice %23 {offsets = [0, 0], sizes = [8, 32], strides = [1, 1]} : vector<16x32xf32> to vector<8x32xf32>
    %35 = arith.mulf %33, %34 : vector<8x32xf32>
    %cst_33 = arith.constant dense<0.000000e+00> : vector<8x4xf32>
    %36 = tpu.matmul %35, %8, %cst_33 {dimension_numbers = #tpu.dot_dimension_numbers<[1], [0], [0], [1], [0, 0, 1, 1], [], []>} : vector<8x32xf32>, vector<32x4xf32>, vector<8x4xf32> -> vector<8x4xf32>
    %37 = vector.extract_strided_slice %23 {offsets = [8, 0], sizes = [8, 32], strides = [1, 1]} : vector<16x32xf32> to vector<8x32xf32>
    %38 = arith.mulf %33, %37 : vector<8x32xf32>
    %cst_34 = arith.constant dense<0.000000e+00> : vector<8x4xf32>
    %39 = tpu.matmul %38, %8, %cst_34 {dimension_numbers = #tpu.dot_dimension_numbers<[1], [0], [0], [1], [0, 0, 1, 1], [], []>} : vector<8x32xf32>, vector<32x4xf32>, vector<8x4xf32> -> vector<8x4xf32>
    %40 = arith.maximumf %36, %39 : vector<8x4xf32>
    %41 = arith.subf %36, %40 : vector<8x4xf32>
    %42 = math.exp %41 : vector<8x4xf32>
    %43 = arith.subf %39, %40 : vector<8x4xf32>
    %44 = math.exp %43 : vector<8x4xf32>
    %45 = arith.addf %42, %44 : vector<8x4xf32>
    %cst_35 = arith.constant 0.000000e+00 : f32
    %46 = vector.broadcast %cst_35 : f32 to vector<8x32xf32>
    %47 = arith.divf %42, %45 : vector<8x4xf32>
    %cst_36 = arith.constant dense<0.000000e+00> : vector<8x32xf32>
    %48 = tpu.matmul %47, %9, %cst_36 {dimension_numbers = #tpu.dot_dimension_numbers<[1], [0], [0], [1], [0, 0, 1, 1], [], []>} : vector<8x4xf32>, vector<4x32xf32>, vector<8x32xf32> -> vector<8x32xf32>
    %49 = vector.extract_strided_slice %30 {offsets = [0, 0], sizes = [8, 32], strides = [1, 1]} : vector<16x32xf32> to vector<8x32xf32>
    %50 = arith.mulf %48, %49 : vector<8x32xf32>
    %51 = arith.addf %46, %50 : vector<8x32xf32>
    %52 = arith.divf %44, %45 : vector<8x4xf32>
    %cst_37 = arith.constant dense<0.000000e+00> : vector<8x32xf32>
    %53 = tpu.matmul %52, %9, %cst_37 {dimension_numbers = #tpu.dot_dimension_numbers<[1], [0], [0], [1], [0, 0, 1, 1], [], []>} : vector<8x4xf32>, vector<4x32xf32>, vector<8x32xf32> -> vector<8x32xf32>
    %54 = vector.extract_strided_slice %30 {offsets = [8, 0], sizes = [8, 32], strides = [1, 1]} : vector<16x32xf32> to vector<8x32xf32>
    %55 = arith.mulf %53, %54 : vector<8x32xf32>
    %56 = arith.addf %51, %55 : vector<8x32xf32>
    %57 = vector.extract_strided_slice %16 {offsets = [8, 0], sizes = [8, 32], strides = [1, 1]} : vector<16x32xf32> to vector<8x32xf32>
    %cst_38 = arith.constant 0.353553385 : f32
    %58 = vector.broadcast %cst_38 : f32 to vector<8x32xf32>
    %59 = arith.mulf %57, %58 : vector<8x32xf32>
    %60 = vector.extract_strided_slice %23 {offsets = [0, 0], sizes = [8, 32], strides = [1, 1]} : vector<16x32xf32> to vector<8x32xf32>
    %61 = arith.mulf %59, %60 : vector<8x32xf32>
    %cst_39 = arith.constant dense<0.000000e+00> : vector<8x4xf32>
    %62 = tpu.matmul %61, %8, %cst_39 {dimension_numbers = #tpu.dot_dimension_numbers<[1], [0], [0], [1], [0, 0, 1, 1], [], []>} : vector<8x32xf32>, vector<32x4xf32>, vector<8x4xf32> -> vector<8x4xf32>
    %63 = vector.extract_strided_slice %23 {offsets = [8, 0], sizes = [8, 32], strides = [1, 1]} : vector<16x32xf32> to vector<8x32xf32>
    %64 = arith.mulf %59, %63 : vector<8x32xf32>
    %cst_40 = arith.constant dense<0.000000e+00> : vector<8x4xf32>
    %65 = tpu.matmul %64, %8, %cst_40 {dimension_numbers = #tpu.dot_dimension_numbers<[1], [0], [0], [1], [0, 0, 1, 1], [], []>} : vector<8x32xf32>, vector<32x4xf32>, vector<8x4xf32> -> vector<8x4xf32>
    %66 = arith.maximumf %62, %65 : vector<8x4xf32>
    %67 = arith.subf %62, %66 : vector<8x4xf32>
    %68 = math.exp %67 : vector<8x4xf32>
    %69 = arith.subf %65, %66 : vector<8x4xf32>
    %70 = math.exp %69 : vector<8x4xf32>
    %71 = arith.addf %68, %70 : vector<8x4xf32>
    %cst_41 = arith.constant 0.000000e+00 : f32
    %72 = vector.broadcast %cst_41 : f32 to vector<8x32xf32>
    %73 = arith.divf %68, %71 : vector<8x4xf32>
    %cst_42 = arith.constant dense<0.000000e+00> : vector<8x32xf32>
    %74 = tpu.matmul %73, %9, %cst_42 {dimension_numbers = #tpu.dot_dimension_numbers<[1], [0], [0], [1], [0, 0, 1, 1], [], []>} : vector<8x4xf32>, vector<4x32xf32>, vector<8x32xf32> -> vector<8x32xf32>
    %75 = vector.extract_strided_slice %30 {offsets = [0, 0], sizes = [8, 32], strides = [1, 1]} : vector<16x32xf32> to vector<8x32xf32>
    %76 = arith.mulf %74, %75 : vector<8x32xf32>
    %77 = arith.addf %72, %76 : vector<8x32xf32>
    %78 = arith.divf %70, %71 : vector<8x4xf32>
    %cst_43 = arith.constant dense<0.000000e+00> : vector<8x32xf32>
    %79 = tpu.matmul %78, %9, %cst_43 {dimension_numbers = #tpu.dot_dimension_numbers<[1], [0], [0], [1], [0, 0, 1, 1], [], []>} : vector<8x4xf32>, vector<4x32xf32>, vector<8x32xf32> -> vector<8x32xf32>
    %80 = vector.extract_strided_slice %30 {offsets = [8, 0], sizes = [8, 32], strides = [1, 1]} : vector<16x32xf32> to vector<8x32xf32>
    %81 = arith.mulf %79, %80 : vector<8x32xf32>
    %82 = arith.addf %77, %81 : vector<8x32xf32>
    %83 = tpu.concatenate %56, %82 in 0 : vector<8x32xf32>, vector<8x32xf32> -> vector<16x32xf32>
    %c0_44 = arith.constant 0 : index
    %c0_45 = arith.constant 0 : index
    %c0_46 = arith.constant 0 : index
    %84 = vector.load %arg10[%c0_44, %c0_45, %c0_46] : memref<2x32x32xf32, #tpu.memory_space<vmem>>, vector<1x32x32xf32>
    %85 = vector.shape_cast %84 : vector<1x32x32xf32> to vector<32x32xf32>
    %cst_47 = arith.constant dense<0.000000e+00> : vector<16x32xf32>
    %86 = tpu.matmul %83, %85, %cst_47 {dimension_numbers = #tpu.dot_dimension_numbers<[1], [0], [0], [1], [0, 0, 1, 1], [], []>} : vector<16x32xf32>, vector<32x32xf32>, vector<16x32xf32> -> vector<16x32xf32>
    %c0_48 = arith.constant 0 : index
    %c0_49 = arith.constant 0 : index
    %c0_50 = arith.constant 0 : index
    %87 = vector.load %arg11[%c0_48, %c0_49, %c0_50] : memref<2x1x32xf32, #tpu.memory_space<vmem>>, vector<1x1x32xf32>
    %88 = vector.shape_cast %87 : vector<1x1x32xf32> to vector<1x32xf32>
    %89 = vector.broadcast %88 : vector<1x32xf32> to vector<16x32xf32>
    %90 = arith.addf %86, %89 : vector<16x32xf32>
    %91 = arith.addf %7, %90 : vector<16x32xf32>
    %c0_51 = arith.constant 0 : index
    %c0_52 = arith.constant 0 : index
    %c0_53 = arith.constant 0 : index
    %92 = vector.load %arg12[%c0_51, %c0_52, %c0_53] : memref<2x1x32xf32, #tpu.memory_space<vmem>>, vector<1x1x32xf32>
    %93 = vector.shape_cast %92 : vector<1x1x32xf32> to vector<1x32xf32>
    %c0_54 = arith.constant 0 : index
    %c0_55 = arith.constant 0 : index
    %c0_56 = arith.constant 0 : index
    %94 = vector.load %arg13[%c0_54, %c0_55, %c0_56] : memref<2x1x32xf32, #tpu.memory_space<vmem>>, vector<1x1x32xf32>
    %95 = vector.shape_cast %94 : vector<1x1x32xf32> to vector<1x32xf32>
    %cst_57 = arith.constant dense<0.000000e+00> : vector<16xf32>
    %96 = vector.multi_reduction <add>, %91, %cst_57 [1] : vector<16x32xf32> to vector<16xf32>
    %97 = vector.shape_cast %96 : vector<16xf32> to vector<16x1xf32>
    %cst_58 = arith.constant 3.200000e+01 : f32
    %98 = vector.broadcast %cst_58 : f32 to vector<16x1xf32>
    %99 = arith.divf %97, %98 : vector<16x1xf32>
    %100 = vector.broadcast %99 : vector<16x1xf32> to vector<16x32xf32>
    %101 = arith.subf %91, %100 : vector<16x32xf32>
    %102 = arith.mulf %101, %101 : vector<16x32xf32>
    %cst_59 = arith.constant dense<0.000000e+00> : vector<16xf32>
    %103 = vector.multi_reduction <add>, %102, %cst_59 [1] : vector<16x32xf32> to vector<16xf32>
    %104 = vector.shape_cast %103 : vector<16xf32> to vector<16x1xf32>
    %cst_60 = arith.constant 3.200000e+01 : f32
    %105 = vector.broadcast %cst_60 : f32 to vector<16x1xf32>
    %106 = arith.divf %104, %105 : vector<16x1xf32>
    %cst_61 = arith.constant 9.99999974E-6 : f32
    %107 = vector.broadcast %cst_61 : f32 to vector<16x1xf32>
    %108 = arith.addf %106, %107 : vector<16x1xf32>
    %109 = math.rsqrt %108 : vector<16x1xf32>
    %110 = vector.broadcast %109 : vector<16x1xf32> to vector<16x32xf32>
    %111 = arith.mulf %101, %110 : vector<16x32xf32>
    %112 = vector.broadcast %93 : vector<1x32xf32> to vector<16x32xf32>
    %113 = arith.mulf %111, %112 : vector<16x32xf32>
    %114 = vector.broadcast %95 : vector<1x32xf32> to vector<16x32xf32>
    %115 = arith.addf %113, %114 : vector<16x32xf32>
    %c0_62 = arith.constant 0 : index
    %c0_63 = arith.constant 0 : index
    %c0_64 = arith.constant 0 : index
    %116 = vector.load %arg16[%c0_62, %c0_63, %c0_64] : memref<2x32x128xf32, #tpu.memory_space<vmem>>, vector<1x32x128xf32>
    %117 = vector.shape_cast %116 : vector<1x32x128xf32> to vector<32x128xf32>
    %cst_65 = arith.constant dense<0.000000e+00> : vector<16x128xf32>
    %118 = tpu.matmul %115, %117, %cst_65 {dimension_numbers = #tpu.dot_dimension_numbers<[1], [0], [0], [1], [0, 0, 1, 1], [], []>} : vector<16x32xf32>, vector<32x128xf32>, vector<16x128xf32> -> vector<16x128xf32>
    %c0_66 = arith.constant 0 : index
    %c0_67 = arith.constant 0 : index
    %c0_68 = arith.constant 0 : index
    %119 = vector.load %arg17[%c0_66, %c0_67, %c0_68] : memref<2x1x128xf32, #tpu.memory_space<vmem>>, vector<1x1x128xf32>
    %120 = vector.shape_cast %119 : vector<1x1x128xf32> to vector<1x128xf32>
    %121 = vector.broadcast %120 : vector<1x128xf32> to vector<16x128xf32>
    %122 = arith.addf %118, %121 : vector<16x128xf32>
    %cst_69 = arith.constant 0.000000e+00 : f32
    %123 = vector.broadcast %cst_69 : f32 to vector<16x128xf32>
    %124 = arith.maximumf %122, %123 : vector<16x128xf32>
    %c0_70 = arith.constant 0 : index
    %c0_71 = arith.constant 0 : index
    %c0_72 = arith.constant 0 : index
    %125 = vector.load %arg18[%c0_70, %c0_71, %c0_72] : memref<2x128x32xf32, #tpu.memory_space<vmem>>, vector<1x128x32xf32>
    %126 = vector.shape_cast %125 : vector<1x128x32xf32> to vector<128x32xf32>
    %cst_73 = arith.constant dense<0.000000e+00> : vector<16x32xf32>
    %127 = tpu.matmul %124, %126, %cst_73 {dimension_numbers = #tpu.dot_dimension_numbers<[1], [0], [0], [1], [0, 0, 1, 1], [], []>} : vector<16x128xf32>, vector<128x32xf32>, vector<16x32xf32> -> vector<16x32xf32>
    %c0_74 = arith.constant 0 : index
    %c0_75 = arith.constant 0 : index
    %c0_76 = arith.constant 0 : index
    %128 = vector.load %arg19[%c0_74, %c0_75, %c0_76] : memref<2x1x32xf32, #tpu.memory_space<vmem>>, vector<1x1x32xf32>
    %129 = vector.shape_cast %128 : vector<1x1x32xf32> to vector<1x32xf32>
    %130 = vector.broadcast %129 : vector<1x32xf32> to vector<16x32xf32>
    %131 = arith.addf %127, %130 : vector<16x32xf32>
    %132 = arith.addf %115, %131 : vector<16x32xf32>
    %c0_77 = arith.constant 0 : index
    %c0_78 = arith.constant 0 : index
    %c0_79 = arith.constant 0 : index
    %133 = vector.load %arg14[%c0_77, %c0_78, %c0_79] : memref<2x1x32xf32, #tpu.memory_space<vmem>>, vector<1x1x32xf32>
    %134 = vector.shape_cast %133 : vector<1x1x32xf32> to vector<1x32xf32>
    %c0_80 = arith.constant 0 : index
    %c0_81 = arith.constant 0 : index
    %c0_82 = arith.constant 0 : index
    %135 = vector.load %arg15[%c0_80, %c0_81, %c0_82] : memref<2x1x32xf32, #tpu.memory_space<vmem>>, vector<1x1x32xf32>
    %136 = vector.shape_cast %135 : vector<1x1x32xf32> to vector<1x32xf32>
    %cst_83 = arith.constant dense<0.000000e+00> : vector<16xf32>
    %137 = vector.multi_reduction <add>, %132, %cst_83 [1] : vector<16x32xf32> to vector<16xf32>
    %138 = vector.shape_cast %137 : vector<16xf32> to vector<16x1xf32>
    %cst_84 = arith.constant 3.200000e+01 : f32
    %139 = vector.broadcast %cst_84 : f32 to vector<16x1xf32>
    %140 = arith.divf %138, %139 : vector<16x1xf32>
    %141 = vector.broadcast %140 : vector<16x1xf32> to vector<16x32xf32>
    %142 = arith.subf %132, %141 : vector<16x32xf32>
    %143 = arith.mulf %142, %142 : vector<16x32xf32>
    %cst_85 = arith.constant dense<0.000000e+00> : vector<16xf32>
    %144 = vector.multi_reduction <add>, %143, %cst_85 [1] : vector<16x32xf32> to vector<16xf32>
    %145 = vector.shape_cast %144 : vector<16xf32> to vector<16x1xf32>
    %cst_86 = arith.constant 3.200000e+01 : f32
    %146 = vector.broadcast %cst_86 : f32 to vector<16x1xf32>
    %147 = arith.divf %145, %146 : vector<16x1xf32>
    %cst_87 = arith.constant 9.99999974E-6 : f32
    %148 = vector.broadcast %cst_87 : f32 to vector<16x1xf32>
    %149 = arith.addf %147, %148 : vector<16x1xf32>
    %150 = math.rsqrt %149 : vector<16x1xf32>
    %151 = vector.broadcast %150 : vector<16x1xf32> to vector<16x32xf32>
    %152 = arith.mulf %142, %151 : vector<16x32xf32>
    %153 = vector.broadcast %134 : vector<1x32xf32> to vector<16x32xf32>
    %154 = arith.mulf %152, %153 : vector<16x32xf32>
    %155 = vector.broadcast %136 : vector<1x32xf32> to vector<16x32xf32>
    %156 = arith.addf %154, %155 : vector<16x32xf32>
    %c1 = arith.constant 1 : index
    %c0_88 = arith.constant 0 : index
    %c0_89 = arith.constant 0 : index
    %157 = vector.load %arg4[%c1, %c0_88, %c0_89] : memref<2x32x32xf32, #tpu.memory_space<vmem>>, vector<1x32x32xf32>
    %158 = vector.shape_cast %157 : vector<1x32x32xf32> to vector<32x32xf32>
    %cst_90 = arith.constant dense<0.000000e+00> : vector<16x32xf32>
    %159 = tpu.matmul %156, %158, %cst_90 {dimension_numbers = #tpu.dot_dimension_numbers<[1], [0], [0], [1], [0, 0, 1, 1], [], []>} : vector<16x32xf32>, vector<32x32xf32>, vector<16x32xf32> -> vector<16x32xf32>
    %c1_91 = arith.constant 1 : index
    %c0_92 = arith.constant 0 : index
    %c0_93 = arith.constant 0 : index
    %160 = vector.load %arg7[%c1_91, %c0_92, %c0_93] : memref<2x1x32xf32, #tpu.memory_space<vmem>>, vector<1x1x32xf32>
    %161 = vector.shape_cast %160 : vector<1x1x32xf32> to vector<1x32xf32>
    %162 = vector.broadcast %161 : vector<1x32xf32> to vector<16x32xf32>
    %163 = arith.addf %159, %162 : vector<16x32xf32>
    %c1_94 = arith.constant 1 : index
    %c0_95 = arith.constant 0 : index
    %c0_96 = arith.constant 0 : index
    %164 = vector.load %arg5[%c1_94, %c0_95, %c0_96] : memref<2x32x32xf32, #tpu.memory_space<vmem>>, vector<1x32x32xf32>
    %165 = vector.shape_cast %164 : vector<1x32x32xf32> to vector<32x32xf32>
    %cst_97 = arith.constant dense<0.000000e+00> : vector<16x32xf32>
    %166 = tpu.matmul %156, %165, %cst_97 {dimension_numbers = #tpu.dot_dimension_numbers<[1], [0], [0], [1], [0, 0, 1, 1], [], []>} : vector<16x32xf32>, vector<32x32xf32>, vector<16x32xf32> -> vector<16x32xf32>
    %c1_98 = arith.constant 1 : index
    %c0_99 = arith.constant 0 : index
    %c0_100 = arith.constant 0 : index
    %167 = vector.load %arg8[%c1_98, %c0_99, %c0_100] : memref<2x1x32xf32, #tpu.memory_space<vmem>>, vector<1x1x32xf32>
    %168 = vector.shape_cast %167 : vector<1x1x32xf32> to vector<1x32xf32>
    %169 = vector.broadcast %168 : vector<1x32xf32> to vector<16x32xf32>
    %170 = arith.addf %166, %169 : vector<16x32xf32>
    %c1_101 = arith.constant 1 : index
    %c0_102 = arith.constant 0 : index
    %c0_103 = arith.constant 0 : index
    %171 = vector.load %arg6[%c1_101, %c0_102, %c0_103] : memref<2x32x32xf32, #tpu.memory_space<vmem>>, vector<1x32x32xf32>
    %172 = vector.shape_cast %171 : vector<1x32x32xf32> to vector<32x32xf32>
    %cst_104 = arith.constant dense<0.000000e+00> : vector<16x32xf32>
    %173 = tpu.matmul %156, %172, %cst_104 {dimension_numbers = #tpu.dot_dimension_numbers<[1], [0], [0], [1], [0, 0, 1, 1], [], []>} : vector<16x32xf32>, vector<32x32xf32>, vector<16x32xf32> -> vector<16x32xf32>
    %c1_105 = arith.constant 1 : index
    %c0_106 = arith.constant 0 : index
    %c0_107 = arith.constant 0 : index
    %174 = vector.load %arg9[%c1_105, %c0_106, %c0_107] : memref<2x1x32xf32, #tpu.memory_space<vmem>>, vector<1x1x32xf32>
    %175 = vector.shape_cast %174 : vector<1x1x32xf32> to vector<1x32xf32>
    %176 = vector.broadcast %175 : vector<1x32xf32> to vector<16x32xf32>
    %177 = arith.addf %173, %176 : vector<16x32xf32>
    %178 = vector.extract_strided_slice %163 {offsets = [0, 0], sizes = [8, 32], strides = [1, 1]} : vector<16x32xf32> to vector<8x32xf32>
    %cst_108 = arith.constant 0.353553385 : f32
    %179 = vector.broadcast %cst_108 : f32 to vector<8x32xf32>
    %180 = arith.mulf %178, %179 : vector<8x32xf32>
    %181 = vector.extract_strided_slice %170 {offsets = [0, 0], sizes = [8, 32], strides = [1, 1]} : vector<16x32xf32> to vector<8x32xf32>
    %182 = arith.mulf %180, %181 : vector<8x32xf32>
    %cst_109 = arith.constant dense<0.000000e+00> : vector<8x4xf32>
    %183 = tpu.matmul %182, %8, %cst_109 {dimension_numbers = #tpu.dot_dimension_numbers<[1], [0], [0], [1], [0, 0, 1, 1], [], []>} : vector<8x32xf32>, vector<32x4xf32>, vector<8x4xf32> -> vector<8x4xf32>
    %184 = vector.extract_strided_slice %170 {offsets = [8, 0], sizes = [8, 32], strides = [1, 1]} : vector<16x32xf32> to vector<8x32xf32>
    %185 = arith.mulf %180, %184 : vector<8x32xf32>
    %cst_110 = arith.constant dense<0.000000e+00> : vector<8x4xf32>
    %186 = tpu.matmul %185, %8, %cst_110 {dimension_numbers = #tpu.dot_dimension_numbers<[1], [0], [0], [1], [0, 0, 1, 1], [], []>} : vector<8x32xf32>, vector<32x4xf32>, vector<8x4xf32> -> vector<8x4xf32>
    %187 = arith.maximumf %183, %186 : vector<8x4xf32>
    %188 = arith.subf %183, %187 : vector<8x4xf32>
    %189 = math.exp %188 : vector<8x4xf32>
    %190 = arith.subf %186, %187 : vector<8x4xf32>
    %191 = math.exp %190 : vector<8x4xf32>
    %192 = arith.addf %189, %191 : vector<8x4xf32>
    %cst_111 = arith.constant 0.000000e+00 : f32
    %193 = vector.broadcast %cst_111 : f32 to vector<8x32xf32>
    %194 = arith.divf %189, %192 : vector<8x4xf32>
    %cst_112 = arith.constant dense<0.000000e+00> : vector<8x32xf32>
    %195 = tpu.matmul %194, %9, %cst_112 {dimension_numbers = #tpu.dot_dimension_numbers<[1], [0], [0], [1], [0, 0, 1, 1], [], []>} : vector<8x4xf32>, vector<4x32xf32>, vector<8x32xf32> -> vector<8x32xf32>
    %196 = vector.extract_strided_slice %177 {offsets = [0, 0], sizes = [8, 32], strides = [1, 1]} : vector<16x32xf32> to vector<8x32xf32>
    %197 = arith.mulf %195, %196 : vector<8x32xf32>
    %198 = arith.addf %193, %197 : vector<8x32xf32>
    %199 = arith.divf %191, %192 : vector<8x4xf32>
    %cst_113 = arith.constant dense<0.000000e+00> : vector<8x32xf32>
    %200 = tpu.matmul %199, %9, %cst_113 {dimension_numbers = #tpu.dot_dimension_numbers<[1], [0], [0], [1], [0, 0, 1, 1], [], []>} : vector<8x4xf32>, vector<4x32xf32>, vector<8x32xf32> -> vector<8x32xf32>
    %201 = vector.extract_strided_slice %177 {offsets = [8, 0], sizes = [8, 32], strides = [1, 1]} : vector<16x32xf32> to vector<8x32xf32>
    %202 = arith.mulf %200, %201 : vector<8x32xf32>
    %203 = arith.addf %198, %202 : vector<8x32xf32>
    %204 = vector.extract_strided_slice %163 {offsets = [8, 0], sizes = [8, 32], strides = [1, 1]} : vector<16x32xf32> to vector<8x32xf32>
    %cst_114 = arith.constant 0.353553385 : f32
    %205 = vector.broadcast %cst_114 : f32 to vector<8x32xf32>
    %206 = arith.mulf %204, %205 : vector<8x32xf32>
    %207 = vector.extract_strided_slice %170 {offsets = [0, 0], sizes = [8, 32], strides = [1, 1]} : vector<16x32xf32> to vector<8x32xf32>
    %208 = arith.mulf %206, %207 : vector<8x32xf32>
    %cst_115 = arith.constant dense<0.000000e+00> : vector<8x4xf32>
    %209 = tpu.matmul %208, %8, %cst_115 {dimension_numbers = #tpu.dot_dimension_numbers<[1], [0], [0], [1], [0, 0, 1, 1], [], []>} : vector<8x32xf32>, vector<32x4xf32>, vector<8x4xf32> -> vector<8x4xf32>
    %210 = vector.extract_strided_slice %170 {offsets = [8, 0], sizes = [8, 32], strides = [1, 1]} : vector<16x32xf32> to vector<8x32xf32>
    %211 = arith.mulf %206, %210 : vector<8x32xf32>
    %cst_116 = arith.constant dense<0.000000e+00> : vector<8x4xf32>
    %212 = tpu.matmul %211, %8, %cst_116 {dimension_numbers = #tpu.dot_dimension_numbers<[1], [0], [0], [1], [0, 0, 1, 1], [], []>} : vector<8x32xf32>, vector<32x4xf32>, vector<8x4xf32> -> vector<8x4xf32>
    %213 = arith.maximumf %209, %212 : vector<8x4xf32>
    %214 = arith.subf %209, %213 : vector<8x4xf32>
    %215 = math.exp %214 : vector<8x4xf32>
    %216 = arith.subf %212, %213 : vector<8x4xf32>
    %217 = math.exp %216 : vector<8x4xf32>
    %218 = arith.addf %215, %217 : vector<8x4xf32>
    %cst_117 = arith.constant 0.000000e+00 : f32
    %219 = vector.broadcast %cst_117 : f32 to vector<8x32xf32>
    %220 = arith.divf %215, %218 : vector<8x4xf32>
    %cst_118 = arith.constant dense<0.000000e+00> : vector<8x32xf32>
    %221 = tpu.matmul %220, %9, %cst_118 {dimension_numbers = #tpu.dot_dimension_numbers<[1], [0], [0], [1], [0, 0, 1, 1], [], []>} : vector<8x4xf32>, vector<4x32xf32>, vector<8x32xf32> -> vector<8x32xf32>
    %222 = vector.extract_strided_slice %177 {offsets = [0, 0], sizes = [8, 32], strides = [1, 1]} : vector<16x32xf32> to vector<8x32xf32>
    %223 = arith.mulf %221, %222 : vector<8x32xf32>
    %224 = arith.addf %219, %223 : vector<8x32xf32>
    %225 = arith.divf %217, %218 : vector<8x4xf32>
    %cst_119 = arith.constant dense<0.000000e+00> : vector<8x32xf32>
    %226 = tpu.matmul %225, %9, %cst_119 {dimension_numbers = #tpu.dot_dimension_numbers<[1], [0], [0], [1], [0, 0, 1, 1], [], []>} : vector<8x4xf32>, vector<4x32xf32>, vector<8x32xf32> -> vector<8x32xf32>
    %227 = vector.extract_strided_slice %177 {offsets = [8, 0], sizes = [8, 32], strides = [1, 1]} : vector<16x32xf32> to vector<8x32xf32>
    %228 = arith.mulf %226, %227 : vector<8x32xf32>
    %229 = arith.addf %224, %228 : vector<8x32xf32>
    %230 = tpu.concatenate %203, %229 in 0 : vector<8x32xf32>, vector<8x32xf32> -> vector<16x32xf32>
    %c1_120 = arith.constant 1 : index
    %c0_121 = arith.constant 0 : index
    %c0_122 = arith.constant 0 : index
    %231 = vector.load %arg10[%c1_120, %c0_121, %c0_122] : memref<2x32x32xf32, #tpu.memory_space<vmem>>, vector<1x32x32xf32>
    %232 = vector.shape_cast %231 : vector<1x32x32xf32> to vector<32x32xf32>
    %cst_123 = arith.constant dense<0.000000e+00> : vector<16x32xf32>
    %233 = tpu.matmul %230, %232, %cst_123 {dimension_numbers = #tpu.dot_dimension_numbers<[1], [0], [0], [1], [0, 0, 1, 1], [], []>} : vector<16x32xf32>, vector<32x32xf32>, vector<16x32xf32> -> vector<16x32xf32>
    %c1_124 = arith.constant 1 : index
    %c0_125 = arith.constant 0 : index
    %c0_126 = arith.constant 0 : index
    %234 = vector.load %arg11[%c1_124, %c0_125, %c0_126] : memref<2x1x32xf32, #tpu.memory_space<vmem>>, vector<1x1x32xf32>
    %235 = vector.shape_cast %234 : vector<1x1x32xf32> to vector<1x32xf32>
    %236 = vector.broadcast %235 : vector<1x32xf32> to vector<16x32xf32>
    %237 = arith.addf %233, %236 : vector<16x32xf32>
    %238 = arith.addf %156, %237 : vector<16x32xf32>
    %c1_127 = arith.constant 1 : index
    %c0_128 = arith.constant 0 : index
    %c0_129 = arith.constant 0 : index
    %239 = vector.load %arg12[%c1_127, %c0_128, %c0_129] : memref<2x1x32xf32, #tpu.memory_space<vmem>>, vector<1x1x32xf32>
    %240 = vector.shape_cast %239 : vector<1x1x32xf32> to vector<1x32xf32>
    %c1_130 = arith.constant 1 : index
    %c0_131 = arith.constant 0 : index
    %c0_132 = arith.constant 0 : index
    %241 = vector.load %arg13[%c1_130, %c0_131, %c0_132] : memref<2x1x32xf32, #tpu.memory_space<vmem>>, vector<1x1x32xf32>
    %242 = vector.shape_cast %241 : vector<1x1x32xf32> to vector<1x32xf32>
    %cst_133 = arith.constant dense<0.000000e+00> : vector<16xf32>
    %243 = vector.multi_reduction <add>, %238, %cst_133 [1] : vector<16x32xf32> to vector<16xf32>
    %244 = vector.shape_cast %243 : vector<16xf32> to vector<16x1xf32>
    %cst_134 = arith.constant 3.200000e+01 : f32
    %245 = vector.broadcast %cst_134 : f32 to vector<16x1xf32>
    %246 = arith.divf %244, %245 : vector<16x1xf32>
    %247 = vector.broadcast %246 : vector<16x1xf32> to vector<16x32xf32>
    %248 = arith.subf %238, %247 : vector<16x32xf32>
    %249 = arith.mulf %248, %248 : vector<16x32xf32>
    %cst_135 = arith.constant dense<0.000000e+00> : vector<16xf32>
    %250 = vector.multi_reduction <add>, %249, %cst_135 [1] : vector<16x32xf32> to vector<16xf32>
    %251 = vector.shape_cast %250 : vector<16xf32> to vector<16x1xf32>
    %cst_136 = arith.constant 3.200000e+01 : f32
    %252 = vector.broadcast %cst_136 : f32 to vector<16x1xf32>
    %253 = arith.divf %251, %252 : vector<16x1xf32>
    %cst_137 = arith.constant 9.99999974E-6 : f32
    %254 = vector.broadcast %cst_137 : f32 to vector<16x1xf32>
    %255 = arith.addf %253, %254 : vector<16x1xf32>
    %256 = math.rsqrt %255 : vector<16x1xf32>
    %257 = vector.broadcast %256 : vector<16x1xf32> to vector<16x32xf32>
    %258 = arith.mulf %248, %257 : vector<16x32xf32>
    %259 = vector.broadcast %240 : vector<1x32xf32> to vector<16x32xf32>
    %260 = arith.mulf %258, %259 : vector<16x32xf32>
    %261 = vector.broadcast %242 : vector<1x32xf32> to vector<16x32xf32>
    %262 = arith.addf %260, %261 : vector<16x32xf32>
    %c1_138 = arith.constant 1 : index
    %c0_139 = arith.constant 0 : index
    %c0_140 = arith.constant 0 : index
    %263 = vector.load %arg16[%c1_138, %c0_139, %c0_140] : memref<2x32x128xf32, #tpu.memory_space<vmem>>, vector<1x32x128xf32>
    %264 = vector.shape_cast %263 : vector<1x32x128xf32> to vector<32x128xf32>
    %cst_141 = arith.constant dense<0.000000e+00> : vector<16x128xf32>
    %265 = tpu.matmul %262, %264, %cst_141 {dimension_numbers = #tpu.dot_dimension_numbers<[1], [0], [0], [1], [0, 0, 1, 1], [], []>} : vector<16x32xf32>, vector<32x128xf32>, vector<16x128xf32> -> vector<16x128xf32>
    %c1_142 = arith.constant 1 : index
    %c0_143 = arith.constant 0 : index
    %c0_144 = arith.constant 0 : index
    %266 = vector.load %arg17[%c1_142, %c0_143, %c0_144] : memref<2x1x128xf32, #tpu.memory_space<vmem>>, vector<1x1x128xf32>
    %267 = vector.shape_cast %266 : vector<1x1x128xf32> to vector<1x128xf32>
    %268 = vector.broadcast %267 : vector<1x128xf32> to vector<16x128xf32>
    %269 = arith.addf %265, %268 : vector<16x128xf32>
    %cst_145 = arith.constant 0.000000e+00 : f32
    %270 = vector.broadcast %cst_145 : f32 to vector<16x128xf32>
    %271 = arith.maximumf %269, %270 : vector<16x128xf32>
    %c1_146 = arith.constant 1 : index
    %c0_147 = arith.constant 0 : index
    %c0_148 = arith.constant 0 : index
    %272 = vector.load %arg18[%c1_146, %c0_147, %c0_148] : memref<2x128x32xf32, #tpu.memory_space<vmem>>, vector<1x128x32xf32>
    %273 = vector.shape_cast %272 : vector<1x128x32xf32> to vector<128x32xf32>
    %cst_149 = arith.constant dense<0.000000e+00> : vector<16x32xf32>
    %274 = tpu.matmul %271, %273, %cst_149 {dimension_numbers = #tpu.dot_dimension_numbers<[1], [0], [0], [1], [0, 0, 1, 1], [], []>} : vector<16x128xf32>, vector<128x32xf32>, vector<16x32xf32> -> vector<16x32xf32>
    %c1_150 = arith.constant 1 : index
    %c0_151 = arith.constant 0 : index
    %c0_152 = arith.constant 0 : index
    %275 = vector.load %arg19[%c1_150, %c0_151, %c0_152] : memref<2x1x32xf32, #tpu.memory_space<vmem>>, vector<1x1x32xf32>
    %276 = vector.shape_cast %275 : vector<1x1x32xf32> to vector<1x32xf32>
    %277 = vector.broadcast %276 : vector<1x32xf32> to vector<16x32xf32>
    %278 = arith.addf %274, %277 : vector<16x32xf32>
    %279 = arith.addf %262, %278 : vector<16x32xf32>
    %c1_153 = arith.constant 1 : index
    %c0_154 = arith.constant 0 : index
    %c0_155 = arith.constant 0 : index
    %280 = vector.load %arg14[%c1_153, %c0_154, %c0_155] : memref<2x1x32xf32, #tpu.memory_space<vmem>>, vector<1x1x32xf32>
    %281 = vector.shape_cast %280 : vector<1x1x32xf32> to vector<1x32xf32>
    %c1_156 = arith.constant 1 : index
    %c0_157 = arith.constant 0 : index
    %c0_158 = arith.constant 0 : index
    %282 = vector.load %arg15[%c1_156, %c0_157, %c0_158] : memref<2x1x32xf32, #tpu.memory_space<vmem>>, vector<1x1x32xf32>
    %283 = vector.shape_cast %282 : vector<1x1x32xf32> to vector<1x32xf32>
    %cst_159 = arith.constant dense<0.000000e+00> : vector<16xf32>
    %284 = vector.multi_reduction <add>, %279, %cst_159 [1] : vector<16x32xf32> to vector<16xf32>
    %285 = vector.shape_cast %284 : vector<16xf32> to vector<16x1xf32>
    %cst_160 = arith.constant 3.200000e+01 : f32
    %286 = vector.broadcast %cst_160 : f32 to vector<16x1xf32>
    %287 = arith.divf %285, %286 : vector<16x1xf32>
    %288 = vector.broadcast %287 : vector<16x1xf32> to vector<16x32xf32>
    %289 = arith.subf %279, %288 : vector<16x32xf32>
    %290 = arith.mulf %289, %289 : vector<16x32xf32>
    %cst_161 = arith.constant dense<0.000000e+00> : vector<16xf32>
    %291 = vector.multi_reduction <add>, %290, %cst_161 [1] : vector<16x32xf32> to vector<16xf32>
    %292 = vector.shape_cast %291 : vector<16xf32> to vector<16x1xf32>
    %cst_162 = arith.constant 3.200000e+01 : f32
    %293 = vector.broadcast %cst_162 : f32 to vector<16x1xf32>
    %294 = arith.divf %292, %293 : vector<16x1xf32>
    %cst_163 = arith.constant 9.99999974E-6 : f32
    %295 = vector.broadcast %cst_163 : f32 to vector<16x1xf32>
    %296 = arith.addf %294, %295 : vector<16x1xf32>
    %297 = math.rsqrt %296 : vector<16x1xf32>
    %298 = vector.broadcast %297 : vector<16x1xf32> to vector<16x32xf32>
    %299 = arith.mulf %289, %298 : vector<16x32xf32>
    %300 = vector.broadcast %281 : vector<1x32xf32> to vector<16x32xf32>
    %301 = arith.mulf %299, %300 : vector<16x32xf32>
    %302 = vector.broadcast %283 : vector<1x32xf32> to vector<16x32xf32>
    %303 = arith.addf %301, %302 : vector<16x32xf32>
    %c0_164 = arith.constant 0 : index
    %c0_165 = arith.constant 0 : index
    %304 = vector.load %arg22[%c0_164, %c0_165] : memref<16x8xf32, #tpu.memory_space<vmem>>, vector<16x8xf32>
    %cst_166 = arith.constant 0.000000e+00 : f32
    %305 = vector.broadcast %cst_166 : f32 to vector<16x32xf32>
    %306 = vector.extract_strided_slice %304 {offsets = [0, 0], sizes = [16, 1], strides = [1, 1]} : vector<16x8xf32> to vector<16x1xf32>
    %c0_167 = arith.constant 0 : index
    %c0_168 = arith.constant 0 : index
    %c0_169 = arith.constant 0 : index
    %307 = vector.load %arg24[%c0_167, %c0_168, %c0_169] : memref<8x32x32xf32, #tpu.memory_space<vmem>>, vector<1x32x32xf32>
    %308 = vector.shape_cast %307 : vector<1x32x32xf32> to vector<32x32xf32>
    %cst_170 = arith.constant dense<0.000000e+00> : vector<16x32xf32>
    %309 = tpu.matmul %303, %308, %cst_170 {dimension_numbers = #tpu.dot_dimension_numbers<[1], [0], [0], [1], [0, 0, 1, 1], [], []>} : vector<16x32xf32>, vector<32x32xf32>, vector<16x32xf32> -> vector<16x32xf32>
    %310 = vector.broadcast %306 : vector<16x1xf32> to vector<16x32xf32>
    %311 = arith.mulf %310, %309 : vector<16x32xf32>
    %312 = arith.addf %305, %311 : vector<16x32xf32>
    %313 = vector.extract_strided_slice %304 {offsets = [0, 1], sizes = [16, 1], strides = [1, 1]} : vector<16x8xf32> to vector<16x1xf32>
    %c1_171 = arith.constant 1 : index
    %c0_172 = arith.constant 0 : index
    %c0_173 = arith.constant 0 : index
    %314 = vector.load %arg24[%c1_171, %c0_172, %c0_173] : memref<8x32x32xf32, #tpu.memory_space<vmem>>, vector<1x32x32xf32>
    %315 = vector.shape_cast %314 : vector<1x32x32xf32> to vector<32x32xf32>
    %cst_174 = arith.constant dense<0.000000e+00> : vector<16x32xf32>
    %316 = tpu.matmul %303, %315, %cst_174 {dimension_numbers = #tpu.dot_dimension_numbers<[1], [0], [0], [1], [0, 0, 1, 1], [], []>} : vector<16x32xf32>, vector<32x32xf32>, vector<16x32xf32> -> vector<16x32xf32>
    %317 = vector.broadcast %313 : vector<16x1xf32> to vector<16x32xf32>
    %318 = arith.mulf %317, %316 : vector<16x32xf32>
    %319 = arith.addf %312, %318 : vector<16x32xf32>
    %320 = vector.extract_strided_slice %304 {offsets = [0, 2], sizes = [16, 1], strides = [1, 1]} : vector<16x8xf32> to vector<16x1xf32>
    %c2 = arith.constant 2 : index
    %c0_175 = arith.constant 0 : index
    %c0_176 = arith.constant 0 : index
    %321 = vector.load %arg24[%c2, %c0_175, %c0_176] : memref<8x32x32xf32, #tpu.memory_space<vmem>>, vector<1x32x32xf32>
    %322 = vector.shape_cast %321 : vector<1x32x32xf32> to vector<32x32xf32>
    %cst_177 = arith.constant dense<0.000000e+00> : vector<16x32xf32>
    %323 = tpu.matmul %303, %322, %cst_177 {dimension_numbers = #tpu.dot_dimension_numbers<[1], [0], [0], [1], [0, 0, 1, 1], [], []>} : vector<16x32xf32>, vector<32x32xf32>, vector<16x32xf32> -> vector<16x32xf32>
    %324 = vector.broadcast %320 : vector<16x1xf32> to vector<16x32xf32>
    %325 = arith.mulf %324, %323 : vector<16x32xf32>
    %326 = arith.addf %319, %325 : vector<16x32xf32>
    %327 = vector.extract_strided_slice %304 {offsets = [0, 3], sizes = [16, 1], strides = [1, 1]} : vector<16x8xf32> to vector<16x1xf32>
    %c3 = arith.constant 3 : index
    %c0_178 = arith.constant 0 : index
    %c0_179 = arith.constant 0 : index
    %328 = vector.load %arg24[%c3, %c0_178, %c0_179] : memref<8x32x32xf32, #tpu.memory_space<vmem>>, vector<1x32x32xf32>
    %329 = vector.shape_cast %328 : vector<1x32x32xf32> to vector<32x32xf32>
    %cst_180 = arith.constant dense<0.000000e+00> : vector<16x32xf32>
    %330 = tpu.matmul %303, %329, %cst_180 {dimension_numbers = #tpu.dot_dimension_numbers<[1], [0], [0], [1], [0, 0, 1, 1], [], []>} : vector<16x32xf32>, vector<32x32xf32>, vector<16x32xf32> -> vector<16x32xf32>
    %331 = vector.broadcast %327 : vector<16x1xf32> to vector<16x32xf32>
    %332 = arith.mulf %331, %330 : vector<16x32xf32>
    %333 = arith.addf %326, %332 : vector<16x32xf32>
    %334 = vector.extract_strided_slice %304 {offsets = [0, 4], sizes = [16, 1], strides = [1, 1]} : vector<16x8xf32> to vector<16x1xf32>
    %c4 = arith.constant 4 : index
    %c0_181 = arith.constant 0 : index
    %c0_182 = arith.constant 0 : index
    %335 = vector.load %arg24[%c4, %c0_181, %c0_182] : memref<8x32x32xf32, #tpu.memory_space<vmem>>, vector<1x32x32xf32>
    %336 = vector.shape_cast %335 : vector<1x32x32xf32> to vector<32x32xf32>
    %cst_183 = arith.constant dense<0.000000e+00> : vector<16x32xf32>
    %337 = tpu.matmul %303, %336, %cst_183 {dimension_numbers = #tpu.dot_dimension_numbers<[1], [0], [0], [1], [0, 0, 1, 1], [], []>} : vector<16x32xf32>, vector<32x32xf32>, vector<16x32xf32> -> vector<16x32xf32>
    %338 = vector.broadcast %334 : vector<16x1xf32> to vector<16x32xf32>
    %339 = arith.mulf %338, %337 : vector<16x32xf32>
    %340 = arith.addf %333, %339 : vector<16x32xf32>
    %341 = vector.extract_strided_slice %304 {offsets = [0, 5], sizes = [16, 1], strides = [1, 1]} : vector<16x8xf32> to vector<16x1xf32>
    %c5 = arith.constant 5 : index
    %c0_184 = arith.constant 0 : index
    %c0_185 = arith.constant 0 : index
    %342 = vector.load %arg24[%c5, %c0_184, %c0_185] : memref<8x32x32xf32, #tpu.memory_space<vmem>>, vector<1x32x32xf32>
    %343 = vector.shape_cast %342 : vector<1x32x32xf32> to vector<32x32xf32>
    %cst_186 = arith.constant dense<0.000000e+00> : vector<16x32xf32>
    %344 = tpu.matmul %303, %343, %cst_186 {dimension_numbers = #tpu.dot_dimension_numbers<[1], [0], [0], [1], [0, 0, 1, 1], [], []>} : vector<16x32xf32>, vector<32x32xf32>, vector<16x32xf32> -> vector<16x32xf32>
    %345 = vector.broadcast %341 : vector<16x1xf32> to vector<16x32xf32>
    %346 = arith.mulf %345, %344 : vector<16x32xf32>
    %347 = arith.addf %340, %346 : vector<16x32xf32>
    %348 = vector.extract_strided_slice %304 {offsets = [0, 6], sizes = [16, 1], strides = [1, 1]} : vector<16x8xf32> to vector<16x1xf32>
    %c6 = arith.constant 6 : index
    %c0_187 = arith.constant 0 : index
    %c0_188 = arith.constant 0 : index
    %349 = vector.load %arg24[%c6, %c0_187, %c0_188] : memref<8x32x32xf32, #tpu.memory_space<vmem>>, vector<1x32x32xf32>
    %350 = vector.shape_cast %349 : vector<1x32x32xf32> to vector<32x32xf32>
    %cst_189 = arith.constant dense<0.000000e+00> : vector<16x32xf32>
    %351 = tpu.matmul %303, %350, %cst_189 {dimension_numbers = #tpu.dot_dimension_numbers<[1], [0], [0], [1], [0, 0, 1, 1], [], []>} : vector<16x32xf32>, vector<32x32xf32>, vector<16x32xf32> -> vector<16x32xf32>
    %352 = vector.broadcast %348 : vector<16x1xf32> to vector<16x32xf32>
    %353 = arith.mulf %352, %351 : vector<16x32xf32>
    %354 = arith.addf %347, %353 : vector<16x32xf32>
    %355 = vector.extract_strided_slice %304 {offsets = [0, 7], sizes = [16, 1], strides = [1, 1]} : vector<16x8xf32> to vector<16x1xf32>
    %c7 = arith.constant 7 : index
    %c0_190 = arith.constant 0 : index
    %c0_191 = arith.constant 0 : index
    %356 = vector.load %arg24[%c7, %c0_190, %c0_191] : memref<8x32x32xf32, #tpu.memory_space<vmem>>, vector<1x32x32xf32>
    %357 = vector.shape_cast %356 : vector<1x32x32xf32> to vector<32x32xf32>
    %cst_192 = arith.constant dense<0.000000e+00> : vector<16x32xf32>
    %358 = tpu.matmul %303, %357, %cst_192 {dimension_numbers = #tpu.dot_dimension_numbers<[1], [0], [0], [1], [0, 0, 1, 1], [], []>} : vector<16x32xf32>, vector<32x32xf32>, vector<16x32xf32> -> vector<16x32xf32>
    %359 = vector.broadcast %355 : vector<16x1xf32> to vector<16x32xf32>
    %360 = arith.mulf %359, %358 : vector<16x32xf32>
    %361 = arith.addf %354, %360 : vector<16x32xf32>
    %c0_193 = arith.constant 0 : index
    %c0_194 = arith.constant 0 : index
    %362 = vector.load %arg23[%c0_193, %c0_194] : memref<2x16xf32, #tpu.memory_space<vmem>>, vector<2x16xf32>
    %cst_195 = arith.constant dense<0.000000e+00> : vector<2x32xf32>
    %363 = tpu.matmul %362, %361, %cst_195 {dimension_numbers = #tpu.dot_dimension_numbers<[1], [0], [0], [1], [0, 0, 1, 1], [], []>} : vector<2x16xf32>, vector<16x32xf32>, vector<2x32xf32> -> vector<2x32xf32>
    %c0_196 = arith.constant 0 : index
    %c0_197 = arith.constant 0 : index
    %364 = vector.load %arg25[%c0_196, %c0_197] : memref<1x32xf32, #tpu.memory_space<vmem>>, vector<1x32xf32>
    %365 = vector.broadcast %364 : vector<1x32xf32> to vector<2x32xf32>
    %366 = arith.addf %363, %365 : vector<2x32xf32>
    %cst_198 = arith.constant 0.000000e+00 : f32
    %367 = vector.broadcast %cst_198 : f32 to vector<2x32xf32>
    %368 = arith.maximumf %366, %367 : vector<2x32xf32>
    %c0_199 = arith.constant 0 : index
    %c0_200 = arith.constant 0 : index
    %369 = vector.load %arg26[%c0_199, %c0_200] : memref<32x14xf32, #tpu.memory_space<vmem>>, vector<32x14xf32>
    %cst_201 = arith.constant dense<0.000000e+00> : vector<2x14xf32>
    %370 = tpu.matmul %368, %369, %cst_201 {dimension_numbers = #tpu.dot_dimension_numbers<[1], [0], [0], [1], [0, 0, 1, 1], [], []>} : vector<2x32xf32>, vector<32x14xf32>, vector<2x14xf32> -> vector<2x14xf32>
    %c0_202 = arith.constant 0 : index
    %c0_203 = arith.constant 0 : index
    %371 = vector.load %arg27[%c0_202, %c0_203] : memref<1x14xf32, #tpu.memory_space<vmem>>, vector<1x14xf32>
    %372 = vector.broadcast %371 : vector<1x14xf32> to vector<2x14xf32>
    %373 = arith.addf %370, %372 : vector<2x14xf32>
    %c0_204 = arith.constant 0 : index
    %c0_205 = arith.constant 0 : index
    %374 = vector.load %arg28[%c0_204, %c0_205] : memref<2x14xf32, #tpu.memory_space<vmem>>, vector<2x14xf32>
    tpu.vector_store %arg28[%c0_204, %c0_205], %373 {strides = array<i32>} : memref<2x14xf32, #tpu.memory_space<vmem>>, vector<2x14xf32>,
    return
  }
}

</mosaic_0001>

<bundles_post_ra>
// kernel: transformer_forward.1
= control target key start
LH: loop header
LB: loop body
LE: loop exit
PB: predicated region body
PF: predicated region fallthrough
CT: control target
= control target key end

     0   :  { %s6251_s0 = inlined_call_operand.vmem [shape: f32[16,8], index: 0, kind: input, shape index: {}]   ;;  %s6252_s1 = inlined_call_operand.vmem [shape: f32[8,32], index: 1, kind: input, shape index: {}]   ;;  %s6253_s2 = inlined_call_operand.hbm [shape: f32[1,32], index: 2, kind: input, shape index: {}]   ;;  %s6254_s3 = inlined_call_operand.vmem [shape: f32[16,32], index: 3, kind: input, shape index: {}]   ;;  %s6255_s4 = inlined_call_operand.vmem [shape: f32[2,32,32], index: 4, kind: input, shape index: {}]   ;;  %s6256_s5 = inlined_call_operand.vmem [shape: f32[2,32,32], index: 5, kind: input, shape index: {}]   ;;  %s6257_s6 = inlined_call_operand.vmem [shape: f32[2,32,32], index: 6, kind: input, shape index: {}]   ;;  %s6258_s7 = inlined_call_operand.hbm [shape: f32[2,1,32], index: 7, kind: input, shape index: {}]   ;;  %s6259_s8 = inlined_call_operand.hbm [shape: f32[2,1,32], index: 8, kind: input, shape index: {}]   ;;  %s6260_s9 = inlined_call_operand.hbm [shape: f32[2,1,32], index: 9, kind: input, shape index: {}]   ;;  %s6261_s10 = inlined_call_operand.vmem [shape: f32[2,32,32], index: 10, kind: input, shape index: {}]   ;;  %s6262_s11 = inlined_call_operand.hbm [shape: f32[2,1,32], index: 11, kind: input, shape index: {}]   ;;  %s6263_s12 = inlined_call_operand.vmem [shape: f32[2,1,32], index: 12, kind: input, shape index: {}]   ;;  %s6264_s13 = inlined_call_operand.hbm [shape: f32[2,1,32], index: 13, kind: input, shape index: {}]   ;;  %s6265_s14 = inlined_call_operand.vmem [shape: f32[2,1,32], index: 14, kind: input, shape index: {}]   ;;  %s6266_s15 = inlined_call_operand.vmem [shape: f32[2,1,32], index: 15, kind: input, shape index: {}]   ;;  %s6267_s16 = inlined_call_operand.hbm [shape: f32[2,32,128], index: 16, kind: input, shape index: {}]   ;;  %s6268_s17 = inlined_call_operand.hbm [shape: f32[2,1,128], index: 17, kind: input, shape index: {}]   ;;  %s6269_s18 = inlined_call_operand.vmem [shape: f32[2,128,32], index: 18, kind: input, shape index: {}]   ;;  %s6270_s19 = inlined_call_operand.hbm [shape: f32[2,1,32], index: 19, kind: input, shape index: {}]   ;;  %s6271_s20 = inlined_call_operand.vmem [shape: f32[32,4], index: 20, kind: input, shape index: {}]   ;;  %s6272_s21 = inlined_call_operand.hbm [shape: f32[4,32], index: 21, kind: input, shape index: {}]   ;;  %s6273_s22 = inlined_call_operand.vmem [shape: f32[16,8], index: 22, kind: input, shape index: {}]   ;;  %s6274_s23 = inlined_call_operand.hbm [shape: f32[2,16], index: 23, kind: input, shape index: {}]   ;;  %s6275_s24 = inlined_call_operand.vmem [shape: f32[8,32,32], index: 24, kind: input, shape index: {}]   ;;  %s6276_s25 = inlined_call_operand.hbm [shape: f32[1,32], index: 25, kind: input, shape index: {}]   ;;  %s6277_s26 = inlined_call_operand.vmem [shape: f32[32,14], index: 26, kind: input, shape index: {}]   ;;  %s6278_s27 = inlined_call_operand.hbm [shape: f32[1,14], index: 27, kind: input, shape index: {}]   ;;  %s6279_s28 = inlined_call_operand.hbm [shape: f32[2,14], index: 28, kind: output, shape index: {}]  }
   0x1   :  { %6295 = sst [smem:[#allocation32_spill]] %s6251_s0 }
   0x2   :  { %6296 = sst [smem:[#allocation33_spill]] %s6252_s1 }
   0x3   :  { %6297 = sst [smem:[#allocation34_spill]] %s6253_s2 }
   0x4   :  { %6298 = sst [smem:[#allocation35_spill]] %s6254_s3 }
   0x5   :  { %6299 = sst [smem:[#allocation36_spill]] %s6255_s4 }
   0x6   :  { %6300 = sst [smem:[#allocation37_spill]] %s6256_s5 }
   0x7   :  { %6301 = sst [smem:[#allocation38_spill]] %s6257_s6 }
   0x8   :  { %6302 = sst [smem:[#allocation39_spill]] %s6258_s7 }
   0x9   :  { %6303 = sst [smem:[#allocation40_spill]] %s6259_s8 }
   0xa   :  { %6304 = sst [smem:[#allocation41_spill]] %s6260_s9 }
   0xb   :  { %6305 = sst [smem:[#allocation42_spill]] %s6261_s10 }
   0xc   :  { %6306 = sst [smem:[#allocation43_spill]] %s6262_s11 }
   0xd   :  { %6307 = sst [smem:[#allocation44_spill]] %s6263_s12 }
   0xe   :  { %6308 = sst [smem:[#allocation45_spill]] %s6273_s22 }
   0xf   :  { %6309 = sst [smem:[#allocation46_spill]] %s6277_s26 }
  0x10   :  { %6310 = sst [smem:[#allocation47_spill]] %s6279_s28 }
  0x11   :  { %33 = vsyncpa [#allocation3], 0 }
  0x12   :  { %34 = vsyncpa [#allocation6], 0 }
  0x13   :  { %35 = vsyncpa [#allocation9], 0 }
  0x14   :  { %36 = vsyncpa [#allocation12], 0 }
  0x15   :  { %37 = vsyncpa [#allocation15], 0 }
  0x16   :  { %38 = vsyncpa [#allocation18], 0 }
  0x17   :  { %39 = vsyncpa [#allocation21], 0 }
  0x18   :  { %40 = vsyncpa [#allocation4], 0  ;;  %s5285_s8 = smov [#allocation5]   ;;  %s6311_s3 = sld [smem:[#allocation39_spill]] }
  0x19   :  { %s68_s5 = sshll.u32 %s5285_s8, 4  ;;  %s69_s5 = int_to_ptr.vmem [resolvable:$true] %s68_s5 }
  0x1e   :  { %s4961_s6 = scalar_lea.hbm %s6311_s3, 32 }
  0x1f   :  { %p4962_p0 = scmp.ne.s32.totalorder %s6311_s3, %s4961_s6  ;;  %p4965_p1 = scmp.lt.u32.totalorder %s4961_s6, %s6311_s3 }
  0x21   :  { %p4967_p2 = pnand %p4965_p1, %p4962_p0 }
  0x23   :  { %4970 = shalt.err (!%p4967_p2)
}
  0x24   :  { %s4971_s2 = scalar_lea.vmem %s69_s5, 32  ;;  %p4976_p4 = scmp.lt.s32.totalorder %s69_s5, %s69_s5 }
  0x25   :  { %p4972_p3 = scmp.ne.s32.totalorder %s69_s5, %s4971_s2  ;;  %p4977_p5 = scmp.lt.s32.totalorder %s4971_s2, %s4971_s2 }
  0x27   :  { %p4978_p6 = por %p4977_p5, %p4976_p4 }
  0x29   :  { %p4979_p7 = pnand %p4978_p6, %p4972_p3 }
  0x2b   :  { %4982 = shalt.err (!%p4979_p7)
}
  0x2c   :  { %s5286_s7 = smov 16   ;;  %s5287_s12 = smov 1  }
  0x2d   :  { %74 = dma.hbm_to_vmem [thread:$0]  %s6311_s3, 32, %s69_s5, [#allocation6], %s5286_s7, %s5286_s7, %s5287_s12  }
  0x2e   :  { %s5288_s8 = smov [#allocation8]   ;;  %s5289_s30 = smov [#allocation11]  }
  0x2f   :  { %s92_s9 = sshll.u32 %s5288_s8, 4  ;;  %s120_s6 = sshll.u32 %s5289_s30, 4  ;;  %s93_s9 = int_to_ptr.vmem [resolvable:$true] %s92_s9  ;;  %s121_s6 = int_to_ptr.vmem [resolvable:$true] %s120_s6 }
  0x30   :  { %s6312_s11 = sld [smem:[#allocation41_spill]] }
  0x36   :  { %s4983_s29 = scalar_lea.hbm %s6312_s11, 32 }
  0x37   :  { %p4984_p8 = scmp.ne.s32.totalorder %s6312_s11, %s4983_s29  ;;  %p4987_p9 = scmp.lt.u32.totalorder %s4983_s29, %s6312_s11 }
  0x39   :  { %p4989_p10 = pnand %p4987_p9, %p4984_p8 }
  0x3b   :  { %4992 = shalt.err (!%p4989_p10)
}
  0x3c   :  { %s4993_s5 = scalar_lea.vmem %s93_s9, 32  ;;  %p4998_p12 = scmp.lt.s32.totalorder %s93_s9, %s93_s9 }
  0x3d   :  { %p4994_p11 = scmp.ne.s32.totalorder %s93_s9, %s4993_s5  ;;  %p4999_p13 = scmp.lt.s32.totalorder %s4993_s5, %s4993_s5 }
  0x3f   :  { %p5000_p0 = por %p4999_p13, %p4998_p12 }
  0x41   :  { %p5001_p1 = pnand %p5000_p0, %p4994_p11 }
  0x43   :  { %5004 = shalt.err (!%p5001_p1)
}
  0x44   :  { %98 = dma.hbm_to_vmem [thread:$0]  %s6312_s11, 32, %s93_s9, [#allocation9], %s5286_s7, %s5286_s7, %s5287_s12  }
  0x45   :  { %s5005_s26 = scalar_lea.hbm %s6264_s13, 32 }
  0x46   :  { %p5006_p2 = scmp.ne.s32.totalorder %s6264_s13, %s5005_s26  ;;  %p5009_p3 = scmp.lt.u32.totalorder %s5005_s26, %s6264_s13 }
  0x48   :  { %p5011_p4 = pnand %p5009_p3, %p5006_p2 }
  0x4a   :  { %5014 = shalt.err (!%p5011_p4)
}
  0x4b   :  { %s5015_s0 = scalar_lea.vmem %s121_s6, 32  ;;  %p5020_p6 = scmp.lt.s32.totalorder %s121_s6, %s121_s6 }
  0x4c   :  { %p5016_p5 = scmp.ne.s32.totalorder %s121_s6, %s5015_s0  ;;  %p5021_p7 = scmp.lt.s32.totalorder %s5015_s0, %s5015_s0 }
  0x4e   :  { %p5022_p8 = por %p5021_p7, %p5020_p6 }
  0x50   :  { %p5023_p9 = pnand %p5022_p8, %p5016_p5 }
  0x52   :  { %5026 = shalt.err (!%p5023_p9)
}
  0x53   :  { %126 = dma.hbm_to_vmem [thread:$0]  %s6264_s13, 32, %s121_s6, [#allocation12], %s5286_s7, %s5286_s7, %s5287_s12  }
  0x54   :  { %s5290_s29 = smov [#allocation14]   ;;  %s5291_s5 = smov [#allocation17]  }
  0x55   :  { %s148_s2 = sshll.u32 %s5290_s29, 4  ;;  %s177_s3 = sshll.u32 %s5291_s5, 4  ;;  %s149_s2 = int_to_ptr.vmem [resolvable:$true] %s148_s2  ;;  %s178_s3 = int_to_ptr.vmem [resolvable:$true] %s177_s3 }
  0x56   :  { %s5027_s22 = scalar_lea.hbm %s6268_s17, 32 }
  0x57   :  { %p5028_p10 = scmp.ne.s32.totalorder %s6268_s17, %s5027_s22  ;;  %p5031_p11 = scmp.lt.u32.totalorder %s5027_s22, %s6268_s17 }
  0x59   :  { %p5033_p12 = pnand %p5031_p11, %p5028_p10 }
  0x5b   :  { %5036 = shalt.err (!%p5033_p12)
}
  0x5c   :  { %s5037_s13 = scalar_lea.vmem %s149_s2, 32  ;;  %p5042_p0 = scmp.lt.s32.totalorder %s149_s2, %s149_s2 }
  0x5d   :  { %p5038_p13 = scmp.ne.s32.totalorder %s149_s2, %s5037_s13  ;;  %p5043_p1 = scmp.lt.s32.totalorder %s5037_s13, %s5037_s13 }
  0x5f   :  { %p5044_p2 = por %p5043_p1, %p5042_p0 }
  0x61   :  { %p5045_p3 = pnand %p5044_p2, %p5038_p13 }
  0x63   :  { %5048 = shalt.err (!%p5045_p3)
}
  0x64   :  { %154 = dma.hbm_to_vmem [thread:$0]  %s6268_s17, 32, %s149_s2, [#allocation15], %s5286_s7, %s5286_s7, %s5287_s12  }
  0x65   :  { %s5049_s11 = scalar_lea.hbm %s6272_s21, 64 }
  0x66   :  { %p5050_p4 = scmp.ne.s32.totalorder %s6272_s21, %s5049_s11  ;;  %p5053_p5 = scmp.lt.u32.totalorder %s5049_s11, %s6272_s21 }
  0x68   :  { %p5055_p6 = pnand %p5053_p5, %p5050_p4 }
  0x6a   :  { %5058 = shalt.err (!%p5055_p6)
}
  0x6b   :  { %s5059_s22 = scalar_lea.vmem %s178_s3, 64  ;;  %p5064_p8 = scmp.lt.s32.totalorder %s178_s3, %s178_s3 }
  0x6c   :  { %p5060_p7 = scmp.ne.s32.totalorder %s178_s3, %s5059_s22  ;;  %p5065_p9 = scmp.lt.s32.totalorder %s5059_s22, %s5059_s22 }
  0x6e   :  { %p5066_p10 = por %p5065_p9, %p5064_p8 }
  0x70   :  { %p5067_p11 = pnand %p5066_p10, %p5060_p7 }
  0x72   :  { %5070 = shalt.err (!%p5067_p11)
}
  0x73   :  { %180 = dma.hbm_to_vmem [thread:$0]  %s6272_s21, 64, %s178_s3, [#allocation18]  }
  0x74   :  { %s5292_s26 = smov [#allocation20]   ;;  %s5293_s8 = smov [#allocation2]  }
  0x75   :  { %s201_s4 = sshll.u32 %s5292_s26, 4  ;;  %s51_s30 = sshll.u32 %s5293_s8, 4  ;;  %s202_s4 = int_to_ptr.vmem [resolvable:$true] %s201_s4  ;;  %s52_s30 = int_to_ptr.vmem [resolvable:$true] %s51_s30 }
  0x76   :  { %s5071_s10 = scalar_lea.hbm %s6276_s25, 16 }
  0x77   :  { %p5072_p12 = scmp.ne.s32.totalorder %s6276_s25, %s5071_s10  ;;  %p5075_p13 = scmp.lt.u32.totalorder %s5071_s10, %s6276_s25 }
  0x79   :  { %p5077_p0 = pnand %p5075_p13, %p5072_p12 }
  0x7b   :  { %5080 = shalt.err (!%p5077_p0)
}
  0x7c   :  { %s5081_s21 = scalar_lea.vmem %s202_s4, 16  ;;  %s5085_s3 = scalar_lea.vmem %s202_s4, 32 }
  0x7d   :  { %p5082_p1 = scmp.ne.s32.totalorder %s202_s4, %s5081_s21  ;;  %p5086_p2 = scmp.lt.s32.totalorder %s202_s4, %s202_s4 }
  0x7e   :  { %p5087_p3 = scmp.lt.s32.totalorder %s5085_s3, %s5081_s21 }
  0x80   :  { %p5088_p4 = por %p5087_p3, %p5086_p2 }
  0x82   :  { %p5089_p5 = pnand %p5088_p4, %p5082_p1 }
  0x84   :  { %5092 = shalt.err (!%p5089_p5)
}
  0x85   :  { %204 = dma.hbm_to_vmem [thread:$0]  %s6276_s25, 16, %s202_s4, [#allocation21]  }
  0x86   :  { %s6313_s17 = sld [smem:[#allocation34_spill]] }
  0x8c   :  { %s5093_s2 = scalar_lea.hbm %s6313_s17, 16 }
  0x8d   :  { %p5094_p6 = scmp.ne.s32.totalorder %s6313_s17, %s5093_s2  ;;  %p5097_p7 = scmp.lt.u32.totalorder %s5093_s2, %s6313_s17 }
  0x8f   :  { %p5099_p8 = pnand %p5097_p7, %p5094_p6 }
  0x91   :  { %5102 = shalt.err (!%p5099_p8)
}
  0x92   :  { %s5103_s10 = scalar_lea.vmem %s52_s30, 16  ;;  %s5107_s0 = scalar_lea.vmem %s52_s30, 32 }
  0x93   :  { %p5104_p9 = scmp.ne.s32.totalorder %s52_s30, %s5103_s10  ;;  %p5108_p10 = scmp.lt.s32.totalorder %s52_s30, %s52_s30 }
  0x94   :  { %p5109_p11 = scmp.lt.s32.totalorder %s5107_s0, %s5103_s10 }
  0x96   :  { %p5110_p12 = por %p5109_p11, %p5108_p10 }
  0x98   :  { %p5111_p13 = pnand %p5110_p12, %p5104_p9 }
  0x9a   :  { %5114 = shalt.err (!%p5111_p13)
}
  0x9b   :  { %54 = dma.hbm_to_vmem [thread:$0]  %s6313_s17, 16, %s52_s30, [#allocation3]  }
  0x9c   :  { %s5294_s9 = smov [#allocation7]   ;;  %s5295_s29 = smov [#allocation10]  }
  0x9d   :  { %s80_s11 = sshll.u32 %s5294_s9, 4  ;;  %s106_s21 = sshll.u32 %s5295_s29, 4  ;;  %s81_s11 = int_to_ptr.vmem [resolvable:$true] %s80_s11  ;;  %s107_s21 = int_to_ptr.vmem [resolvable:$true] %s106_s21 }
  0x9e   :  { %s6314_s1 = sld [smem:[#allocation40_spill]] }
  0xa4   :  { %s5115_s28 = scalar_lea.hbm %s6314_s1, 32 }
  0xa5   :  { %p5116_p0 = scmp.ne.s32.totalorder %s6314_s1, %s5115_s28  ;;  %p5119_p1 = scmp.lt.u32.totalorder %s5115_s28, %s6314_s1 }
  0xa7   :  { %p5121_p2 = pnand %p5119_p1, %p5116_p0 }
  0xa9   :  { %5124 = shalt.err (!%p5121_p2)
}
  0xaa   :  { %s5125_s30 = scalar_lea.vmem %s81_s11, 32  ;;  %p5130_p4 = scmp.lt.s32.totalorder %s81_s11, %s81_s11 }
  0xab   :  { %p5126_p3 = scmp.ne.s32.totalorder %s81_s11, %s5125_s30  ;;  %p5131_p5 = scmp.lt.s32.totalorder %s5125_s30, %s5125_s30 }
  0xad   :  { %p5132_p6 = por %p5131_p5, %p5130_p4 }
  0xaf   :  { %p5133_p7 = pnand %p5132_p6, %p5126_p3 }
  0xb1   :  { %5136 = shalt.err (!%p5133_p7)
}
  0xb2   :  { %86 = dma.hbm_to_vmem [thread:$0]  %s6314_s1, 32, %s81_s11, [#allocation6], %s5286_s7, %s5286_s7, %s5287_s12  }
  0xb3   :  { %s6315_s0 = sld [smem:[#allocation43_spill]] }
  0xb9   :  { %s5137_s25 = scalar_lea.hbm %s6315_s0, 32 }
  0xba   :  { %p5138_p8 = scmp.ne.s32.totalorder %s6315_s0, %s5137_s25  ;;  %p5141_p9 = scmp.lt.u32.totalorder %s5137_s25, %s6315_s0 }
  0xbc   :  { %p5143_p10 = pnand %p5141_p9, %p5138_p8 }
  0xbe   :  { %5146 = shalt.err (!%p5143_p10)
}
  0xbf   :  { %s5147_s5 = scalar_lea.vmem %s107_s21, 32  ;;  %p5152_p12 = scmp.lt.s32.totalorder %s107_s21, %s107_s21 }
  0xc0   :  { %p5148_p11 = scmp.ne.s32.totalorder %s107_s21, %s5147_s5  ;;  %p5153_p13 = scmp.lt.s32.totalorder %s5147_s5, %s5147_s5 }
  0xc2   :  { %p5154_p0 = por %p5153_p13, %p5152_p12 }
  0xc4   :  { %p5155_p1 = pnand %p5154_p0, %p5148_p11 }
  0xc6   :  { %5158 = shalt.err (!%p5155_p1)
}
  0xc7   :  { %112 = dma.hbm_to_vmem [thread:$0]  %s6315_s0, 32, %s107_s21, [#allocation9], %s5286_s7, %s5286_s7, %s5287_s12  }
  0xc8   :  { %s5296_s28 = smov [#allocation13]   ;;  %s5159_s8 = scalar_lea.hbm %s6267_s16, 1024 }
  0xc9   :  { %s136_s22 = sshll.u32 %s5296_s28, 4  ;;  %p5160_p2 = scmp.ne.s32.totalorder %s6267_s16, %s5159_s8  ;;  %s137_s22 = int_to_ptr.vmem [resolvable:$true] %s136_s22 }
  0xca   :  { %p5163_p3 = scmp.lt.u32.totalorder %s5159_s8, %s6267_s16 }
  0xcc   :  { %p5165_p4 = pnand %p5163_p3, %p5160_p2 }
  0xce   :  { %5168 = shalt.err (!%p5165_p4)
}
  0xcf   :  { %s5169_s10 = scalar_lea.vmem %s137_s22, 1024  ;;  %p5174_p6 = scmp.lt.s32.totalorder %s137_s22, %s137_s22 }
  0xd0   :  { %p5170_p5 = scmp.ne.s32.totalorder %s137_s22, %s5169_s10  ;;  %p5175_p7 = scmp.lt.s32.totalorder %s5169_s10, %s5169_s10 }
  0xd2   :  { %p5176_p8 = por %p5175_p7, %p5174_p6 }
  0xd4   :  { %p5177_p9 = pnand %p5176_p8, %p5170_p5 }
  0xd6   :  { %5180 = shalt.err (!%p5177_p9)
}
  0xd7   :  { %s5297_s21 = smov 128   ;;  %s5298_s0 = smov 8  }
  0xd8   :  { %142 = dma.hbm_to_vmem [thread:$0]  %s6267_s16, 1024, %s137_s22, [#allocation12], %s5297_s21, %s5297_s21, %s5298_s0  }
  0xd9   :  { %s5299_s9 = smov [#allocation16]   ;;  %s5300_s3 = smov [#allocation19]  }
  0xda   :  { %s162_s29 = sshll.u32 %s5299_s9, 4  ;;  %s189_s5 = sshll.u32 %s5300_s3, 4  ;;  %s163_s29 = int_to_ptr.vmem [resolvable:$true] %s162_s29  ;;  %s190_s5 = int_to_ptr.vmem [resolvable:$true] %s189_s5 }
  0xdb   :  { %s5181_s28 = scalar_lea.hbm %s6270_s19, 32 }
  0xdc   :  { %p5182_p10 = scmp.ne.s32.totalorder %s6270_s19, %s5181_s28  ;;  %p5185_p11 = scmp.lt.u32.totalorder %s5181_s28, %s6270_s19 }
  0xde   :  { %p5187_p12 = pnand %p5185_p11, %p5182_p10 }
  0xe0   :  { %5190 = shalt.err (!%p5187_p12)
}
  0xe1   :  { %s5191_s16 = scalar_lea.vmem %s163_s29, 32  ;;  %p5196_p0 = scmp.lt.s32.totalorder %s163_s29, %s163_s29 }
  0xe2   :  { %p5192_p13 = scmp.ne.s32.totalorder %s163_s29, %s5191_s16  ;;  %p5197_p1 = scmp.lt.s32.totalorder %s5191_s16, %s5191_s16 }
  0xe4   :  { %p5198_p2 = por %p5197_p1, %p5196_p0 }
  0xe6   :  { %p5199_p3 = pnand %p5198_p2, %p5192_p13 }
  0xe8   :  { %5202 = shalt.err (!%p5199_p3)
}
  0xe9   :  { %168 = dma.hbm_to_vmem [thread:$0]  %s6270_s19, 32, %s163_s29, [#allocation15], %s5286_s7, %s5286_s7, %s5287_s12  }
  0xea   :  { %s5203_s10 = scalar_lea.hbm %s6274_s23, 32 }
  0xeb   :  { %p5204_p4 = scmp.ne.s32.totalorder %s6274_s23, %s5203_s10  ;;  %p5207_p5 = scmp.lt.u32.totalorder %s5203_s10, %s6274_s23 }
  0xed   :  { %p5209_p6 = pnand %p5207_p5, %p5204_p4 }
  0xef   :  { %5212 = shalt.err (!%p5209_p6)
}
  0xf0   :  { %s5213_s9 = scalar_lea.vmem %s190_s5, 32  ;;  %p5218_p8 = scmp.lt.s32.totalorder %s190_s5, %s190_s5 }
  0xf1   :  { %p5214_p7 = scmp.ne.s32.totalorder %s190_s5, %s5213_s9  ;;  %p5219_p9 = scmp.lt.s32.totalorder %s5213_s9, %s5213_s9 }
  0xf3   :  { %p5220_p10 = por %p5219_p9, %p5218_p8 }
  0xf5   :  { %p5221_p11 = pnand %p5220_p10, %p5214_p7 }
  0xf7   :  { %5224 = shalt.err (!%p5221_p11)
}
  0xf8   :  { %192 = dma.hbm_to_vmem [thread:$0]  %s6274_s23, 32, %s190_s5, [#allocation18]  }
  0xf9   :  { %s5301_s12 = smov [#allocation22]   ;;  %s5225_s1 = scalar_lea.hbm %s6278_s27, 16 }
  0xfa   :  { %s213_s29 = sshll.u32 %s5301_s12, 4  ;;  %p5226_p12 = scmp.ne.s32.totalorder %s6278_s27, %s5225_s1  ;;  %s214_s29 = int_to_ptr.vmem [resolvable:$true] %s213_s29 }
  0xfb   :  { %p5229_p13 = scmp.lt.u32.totalorder %s5225_s1, %s6278_s27 }
  0xfd   :  { %p5231_p0 = pnand %p5229_p13, %p5226_p12 }
  0xff   :  { %5234 = shalt.err (!%p5231_p0)
}
 0x100   :  { %s5235_s30 = scalar_lea.vmem %s214_s29, 16  ;;  %s5239_s23 = scalar_lea.vmem %s214_s29, 32 }
 0x101   :  { %p5236_p1 = scmp.ne.s32.totalorder %s214_s29, %s5235_s30  ;;  %p5240_p2 = scmp.lt.s32.totalorder %s214_s29, %s214_s29 }
 0x102   :  { %p5241_p3 = scmp.lt.s32.totalorder %s5239_s23, %s5235_s30 }
 0x104   :  { %p5242_p4 = por %p5241_p3, %p5240_p2 }
 0x106   :  { %p5243_p5 = pnand %p5242_p4, %p5236_p1 }
 0x108   :  { %5246 = shalt.err (!%p5243_p5)
}
 0x109   :  { %216 = dma.hbm_to_vmem [thread:$0]  %s6278_s27, 16, %s214_s29, [#allocation21]  }
 0x10a   :  { %5269 = dma.done.wait [#allocation3], 16  }
 0x10b   :  { %5270 = vsyncadd [#allocation3], 4294967280 }
 0x10c   :  { %5271 = dma.done.wait [#allocation6], 64  }
 0x10d   :  { %5272 = vsyncadd [#allocation6], 4294967232 }
 0x10e   :  { %5273 = dma.done.wait [#allocation9], 64  }
 0x10f   :  { %5274 = vsyncadd [#allocation9], 4294967232 }
 0x110   :  { %5275 = dma.done.wait [#allocation12], 1056  }
 0x111   :  { %5276 = vsyncadd [#allocation12], 4294966240 }
 0x112   :  { %5277 = dma.done.wait [#allocation15], 64  }
 0x113   :  { %5278 = vsyncadd [#allocation15], 4294967232 }
 0x114   :  { %5279 = dma.done.wait [#allocation18], 96  }
 0x115   :  { %5280 = vsyncadd [#allocation18], 4294967200 }
 0x116   :  { %5281 = dma.done.wait [#allocation21], 32  }
 0x117   :  { %5282 = vsyncadd [#allocation21], 4294967264  ;;  %vm266_vm0 = vcmask 64512   ;;  %s6316_s13 = sld [smem:[#allocation33_spill]]  ;;  %s6317_s10 = sld [smem:[#allocation32_spill]]  ;;  %v5302_v18 = vmov 0.0|0.0  }
 0x118   :  { %s6318_s9 = sld [smem:[#allocation36_spill]]  ;;  %s6319_s3 = sld [smem:[#allocation37_spill]]  ;;  %v3835_v19 = vld [vmem:[#allocation2] ss:$0 sm:$0xff]  ;;  %vm368_vm1 = vcmask 261120   ;;  %v353_v32 = vld [vmem:[%s6271_s20 + $0x8] sm:$0xff] }
 0x119   :  { %s6321_s0 = sld [smem:[#allocation35_spill]]  ;;  %v352_v31 = vld [vmem:[%s6271_s20] sm:$0xff]  ;;  %v354_v34 = vld [vmem:[%s6271_s20 + $0x10] sm:$0xff]  ;;  %v355_v35 = vld [vmem:[%s6271_s20 + $0x18] sm:$0xff]  ;;  %vm5303_vm2 = vmmov 0   ;;  %v5304_v37 = vmov 0.0  }
 0x11a   :  { %v5711_v33 = vpack.c.bf16 %v353_v32, %v352_v31  ;;  %v5723_v36 = vpack.c.bf16 %v355_v35, %v354_v34  ;;  %v3838_v38 = vld [vmem:[#allocation5] ss:$0 sm:$0xff]  ;;  %v3841_v39 = vld [vmem:[#allocation7] ss:$0 sm:$0xff]  ;;  %v5746_v56 = vld [vmem:[#allocation17] sm:$0xf] }
 0x11b   :  { %vm785_vm3 = vcmask 1043456   ;;  %vm781_vm4 = vcmask 31744   ;;  %s6322_s16 = sld [smem:[#allocation42_spill]]  ;;  %s6323_s11 = sld [smem:[#allocation44_spill]]  ;;  %vm3653_vm5 = vcmask 130048   ;;  %vm3812_vm6 = vcmask 107520  }
 0x11c   :  { %s6324_s7 = sld [smem:[#allocation45_spill]]  ;;  %s6325_s22 = sld [smem:[#allocation46_spill]] }
 0x11d   :  { %v258_v0 = vld [vmem:[%s6316_s13] sm:$0xff]  ;;  %v257_v2 = vld [vmem:[%s6317_s10 + $0x8] sm:$0xff]  ;;  %s6320_s13 = sld [smem:[#allocation38_spill]] }
 0x11e   :  { %v256_v1 = vld [vmem:[%s6317_s10] sm:$0xff]  ;;  %4196 = vmatprep.subr.mxu1 %v258_v0  ;;  %v358_v4 = vld [vmem:[%s6318_s9 + $0x8] sm:$0xff]  ;;  %v359_v9 = vld [vmem:[%s6318_s9 + $0x10] sm:$0xff] }
 0x11f   :  { %4198 = vmatprep.mubr.msk.f32.mxu1 %vm266_vm0, %v256_v1  ;;  %v357_v3 = vld [vmem:[%s6318_s9] sm:$0xff]  ;;  %4197 = vmatpush3.msra.mxu1 %v258_v0  ;;  %v451_v7 = vld [vmem:[%s6319_s3 + $0x8] sm:$0xff]  ;;  %v360_v10 = vld [vmem:[%s6318_s9 + $0x18] sm:$0xff] }
 0x120   :  { %v450_v5 = vld [vmem:[%s6319_s3] sm:$0xff]  ;;  %v4615_v6 = vpack.c.bf16 %v358_v4, %v357_v3  ;;  %4199 = vmatmul.mubr.msk.f32.vlgmr.msra.gmra.mrb[0].mxu1 %vm266_vm0, %v257_v2  ;;  %v4619_v11 = vpack.c.bf16 %v360_v10, %v359_v9  ;;  %v452_v12 = vld [vmem:[%s6319_s3 + $0x10] sm:$0xff]  ;;  %v453_v13 = vld [vmem:[%s6319_s3 + $0x18] sm:$0xff] }
 0x121   :  { %v4623_v8 = vpack.c.bf16 %v451_v7, %v450_v5  ;;  %v4627_v14 = vpack.c.bf16 %v453_v13, %v452_v12  ;;  %v348_v23 = vld [vmem:[%s6321_s0] sm:$0xff]  ;;  %v349_v24 = vld [vmem:[%s6321_s0 + $0x8] sm:$0xff]  ;;  %s5313_s0 = smov [#allocation23]  }
 0x122   :  { %4616 = vmatprep.subr.bf16.mxu1 %v4615_v6  ;;  %v1247_v10 = vld [vmem:[%s6322_s16] sm:$0xff] }
 0x123   :  { %4618 = vmatpush3.bf16.msra.mxu1 %v4615_v6  ;;  %4624 = vmatprep.subr.bf16.mxu0 %v4623_v8  ;;  %v536_v15 = vld [vmem:[%s6320_s13] sm:$0xff]  ;;  %v537_v16 = vld [vmem:[%s6320_s13 + $0x8] sm:$0xff]  ;;  %v538_v26 = vld [vmem:[%s6320_s13 + $0x10] sm:$0xff] }
 0x124   :  { %4626 = vmatpush3.bf16.msra.mxu0 %v4623_v8  ;;  %4620 = vmatprep.subr.bf16.mxu1 %v4619_v11  ;;  %v4631_v17 = vpack.c.bf16 %v537_v16, %v536_v15  ;;  %v539_v27 = vld [vmem:[%s6320_s13 + $0x18] sm:$0xff]  ;;  %v3844_v13 = vld [vmem:[#allocation8] ss:$0 sm:$0xff] }
 0x125   :  { %4628 = vmatprep.subr.bf16.mxu0 %v4627_v14  ;;  %v4635_v30 = vpack.c.bf16 %v539_v27, %v538_v26 }
 0x127   :  { %4622 = vmatpush3.bf16.msra.mxu1 %v4619_v11  ;;  %v1248_v11 = vld [vmem:[%s6322_s16 + $0x8] sm:$0xff] }
 0x128   :  { %4630 = vmatpush3.bf16.msra.mxu0 %v4627_v14  ;;  %4632 = vmatprep.subr.bf16.mxu1 %v4631_v17  ;;  %v4663_v12 = vpack.c.bf16 %v1248_v11, %v1247_v10  ;;  %v1389_v10 = vld [vmem:[#allocation13 + $0x18] sm:$0xff] }
 0x129   :  { %4639 = vmatprep.subr.bf16.mxu0 %v5302_v18 }
 0x1f3   :  { %v4200_v20 = vpop.f32.mrb[0].mxu1 }
 0x1f4   :  { %v345_v21 = vadd.f32 %v4200_v20, %v3835_v19  ;;  %v339_v22 = vpop.f32.mrb[1].mxu1 }
 0x1f5   :  { %v340_v25 = vadd.f32 %v3835_v19, %v339_v22 }
 0x1f6   :  { %v5690_v29 = vadd.f32 %v349_v24, %v345_v21 }
 0x1f7   :  { %v5688_v28 = vadd.f32 %v348_v23, %v340_v25 }
 0x1f9   :  { %4209 = vmatprep.mubr.msk.f32.mxu1 %vm368_vm1, %v5688_v28  ;;  %4220 = vmatprep.mubr.msk.f32.mxu0 %vm368_vm1, %v5688_v28 }
 0x1fa   :  { %4210 = vmatmul.mubr.msk.f32.vlgmr.msra.gmra.mrb[2].mxu1 %vm368_vm1, %v5690_v29  ;;  %4221 = vmatmul.mubr.msk.f32.vlgmr.msra.gmra.mrb[0].mxu0 %vm368_vm1, %v5690_v29 }
 0x1fb   :  { %4634 = vmatpush3.bf16.msra.mxu1 %v4631_v17  ;;  %4231 = vmatprep.mubr.msk.f32.mxu1 %vm368_vm1, %v5688_v28 }
 0x1fc   :  { %4636 = vmatprep.subr.bf16.mxu1 %v4635_v30  ;;  %4641 = vmatpush3.bf16.msra.mxu0 %v5711_v33 }
 0x1fd   :  { %4642 = vmatprep.subr.bf16.mxu0 %v5302_v18  ;;  %4242 = vmatprep.mubr.msk.f32.mxu0 %vm5303_vm2, %v5304_v37 }
 0x1ff   :  { %4638 = vmatpush3.bf16.msra.mxu1 %v4635_v30 }
 0x200   :  { %4645 = vmatprep.subr.bf16.mxu1 %v5302_v18  ;;  %4644 = vmatpush3.bf16.msra.mxu0 %v5723_v36 }
 0x201   :  { %4256 = vmatprep.subr.mxu0 %v5304_v37 }
 0x202   :  { %4232 = vmatmul.mubr.msk.f32.vlgmr.msra.gmra.mrb[4].mxu1 %vm368_vm1, %v5690_v29 }
 0x203   :  { %4647 = vmatpush3.bf16.msra.mxu1 %v5711_v33  ;;  %4253 = vmatprep.mubr.msk.f32.mxu1 %vm5303_vm2, %v5304_v37 }
 0x204   :  { %4648 = vmatprep.subr.bf16.mxu1 %v5302_v18 }
 0x207   :  { %4650 = vmatpush3.bf16.msra.mxu1 %v5723_v36 }
 0x208   :  { %4651 = vmatprep.subr.bf16.mxu1 %v5302_v18 }
 0x2cd   :  { %v4211_v40 = vpop.f32.mrb[2].mxu1  ;;  %v4222_v41 = vpop.f32.mrb[0].mxu0 }
 0x2ce   :  { %v447_v42 = vadd.f32 %v4211_v40, %v3838_v38  ;;  %v441_v43 = vpop.f32.mrb[3].mxu1  ;;  %v527_v44 = vpop.f32.mrb[1].mxu0  ;;  %v533_v48 = vadd.f32 %v4222_v41, %v3841_v39 }
 0x2cf   :  { %v442_v45 = vadd.f32 %v3838_v38, %v441_v43  ;;  %v528_v46 = vadd.f32 %v3841_v39, %v527_v44  ;;  %v1250_v43 = vld [vmem:[%s6322_s16 + $0x18] sm:$0xff] }
 0x2d0   :  { %v937_v47 = vmul.f32 0.35355338, %v447_v42  ;;  %v1249_v42 = vld [vmem:[%s6322_s16 + $0x10] sm:$0xff] }
 0x2d1   :  { %v622_v49 = vmul.f32 0.35355338, %v442_v45  ;;  %v4667_v44 = vpack.c.bf16 %v1250_v43, %v1249_v42 }
 0x2d2   :  { %v1012_v50 = vmul.f32 %v937_v47, %v533_v48  ;;  %v938_v51 = vmul.f32 %v937_v47, %v528_v46 }
 0x2d3   :  { %v697_v52 = vmul.f32 %v622_v49, %v533_v48  ;;  %v623_v53 = vmul.f32 %v622_v49, %v528_v46 }
 0x2d5   :  { %v4233_v54 = vpop.f32.mrb[4].mxu1  ;;  %4243 = vmatmul.mubr.msk.f32.vlgmr.msra.gmra.mrb[2].mxu0 %vm368_vm1, %v623_v53  ;;  %4254 = vmatmul.mubr.msk.f32.vlgmr.msra.gmra.mrb[6].mxu1 %vm368_vm1, %v697_v52  ;;  %v3859_v52 = vld [vmem:[#allocation10] ss:$0 sm:$0xff] }
 0x2d6   :  { %v613_v55 = vpop.f32.mrb[5].mxu1  ;;  %4653 = vmatpush3.bf16.msra.mxu1 %v5711_v33  ;;  %4274 = vmatprep.mubr.msk.f32.mxu1 %vm5303_vm2, %v5304_v37  ;;  %v619_v16 = vadd.f32 %v4233_v54, %v3844_v13 }
 0x2d7   :  { %4654 = vmatprep.subr.bf16.mxu1 %v5302_v18  ;;  %4258 = vmatprep.mubr.msk.f32.mxu0 %vm5303_vm2, %v5304_v37  ;;  %v614_v17 = vadd.f32 %v3844_v13, %v613_v55  ;;  %v1481_v13 = vld [vmem:[%s6269_s18 + $0x8] sm:$0xff] }
 0x2d8   :  { %4257 = vmatpush3.msk.msra.mxu0 %vm785_vm3, %v5746_v56 }
 0x2d9   :  { %4261 = vmatprep.subr.mxu0 %v5304_v37 }
 0x2da   :  { %4656 = vmatpush3.bf16.msra.mxu1 %v5723_v36 }
 0x2db   :  { %4288 = vmatprep.subr.mxu1 %v5304_v37 }
 0x2dd   :  { %4275 = vmatmul.mubr.msk.f32.vlgmr.msra.gmra.mrb[8].mxu1 %vm368_vm1, %v938_v51 }
 0x2de   :  { %4290 = vmatprep.mubr.msk.f32.mxu1 %vm5303_vm2, %v5304_v37  ;;  %4289 = vmatpush3.msk.msra.mxu1 %vm785_vm3, %v5746_v56 }
 0x2df   :  { %4664 = vmatprep.subr.bf16.mxu1 %v4663_v12 }
 0x3a8   :  { %v693_v57 = vpop.f32.mrb[2].mxu0  ;;  %v767_v58 = vpop.f32.mrb[6].mxu1 }
 0x3a9   :  { %v771_v59 = vmax.f32 %v693_v57, %v767_v58  ;;  %v4244_v60 = vpop.f32.mrb[3].mxu0  ;;  %v4255_v61 = vpop.f32.mrb[7].mxu1 }
 0x3ab   :  { %v772_v62 = vsub.f32 %v693_v57, %v771_v59  ;;  %v775_v63 = vsub.f32 %v767_v58, %v771_v59 }
 0x3ad   :  { %v773_v0 = vmul.f32 1.442695, %v772_v62  ;;  %v776_v1 = vmul.f32 1.442695, %v775_v63 }
 0x3af   :  { %4921 = vpow2.f32 %v773_v0 }
 0x3b0   :  { %4923 = vpow2.f32 %v776_v1  ;;  %v1008_v2 = vpop.f32.mrb[8].mxu1 }
 0x3b1   :  { %v4276_v3 = vpop.f32.mrb[9].mxu1 }
 0x3b9   :  { %v4922_v4 = vpop.eup %4921 }
 0x3ba   :  { %v4924_v5 = vpop.eup %4923 }
 0x3bb   :  { %v778_v6 = vadd.f32 %v4924_v5, %v4922_v4 }
 0x3bd   :  { %4925 = vrcp.f32 %v778_v6  ;;  %v1386_v6 = vld [vmem:[#allocation13] sm:$0xff] }
 0x3c7   :  { %v4926_v7 = vpop.eup %4925 }
 0x3c8   :  { %v780_v8 = vmul.f32 %v4926_v7, %v4922_v4  ;;  %v861_v9 = vmul.f32 %v4926_v7, %v4924_v5  ;;  %v1387_v7 = vld [vmem:[#allocation13 + $0x8] sm:$0xff] }
 0x3ca   :  { %4259 = vmatmul.mubr.msk.f32.vlgmr.msra.gmra.mrb[4].mxu0 %vm781_vm4, %v780_v8  ;;  %v4671_v8 = vpack.c.bf16 %v1387_v7, %v1386_v6 }
 0x3cb   :  { %4262 = vmatpush3.msk.msra.mxu0 %vm785_vm3, %v5746_v56  ;;  %4263 = vmatprep.mubr.msk.f32.mxu0 %vm5303_vm2, %v5304_v37 }
 0x3cc   :  { %4657 = vmatprep.subr.bf16.mxu0 %v5302_v18 }
 0x3ce   :  { %4264 = vmatmul.mubr.msk.f32.vlgmr.msra.gmra.mrb[6].mxu0 %vm781_vm4, %v861_v9  ;;  %v1388_v9 = vld [vmem:[#allocation13 + $0x10] sm:$0xff] }
 0x3cf   :  { %4659 = vmatpush3.bf16.msra.mxu0 %v5711_v33  ;;  %4285 = vmatprep.mubr.msk.f32.mxu0 %vm5303_vm2, %v5304_v37  ;;  %v4675_v11 = vpack.c.bf16 %v1389_v10, %v1388_v9 }
 0x3d0   :  { %4660 = vmatprep.subr.bf16.mxu0 %v5302_v18 }
 0x3d3   :  { %4662 = vmatpush3.bf16.msra.mxu0 %v5723_v36 }
 0x3d4   :  { %4293 = vmatprep.subr.mxu0 %v5304_v37 }
 0x3d6   :  { %4286 = vmatmul.mubr.msk.f32.vlgmr.msra.gmra.mrb[8].mxu0 %vm368_vm1, %v1012_v50 }
 0x3d7   :  { %4294 = vmatpush3.msk.msra.mxu0 %vm785_vm3, %v5746_v56  ;;  %4295 = vmatprep.mubr.msk.f32.mxu0 %vm5303_vm2, %v5304_v37 }
 0x3d8   :  { %4672 = vmatprep.subr.bf16.mxu0 %v4671_v8 }
 0x49d   :  { %v855_v14 = vpop.f32.mrb[4].mxu0 }
 0x49e   :  { %v4260_v15 = vpop.f32.mrb[5].mxu0  ;;  %v859_v20 = vmul.f32 %v855_v14, %v614_v17  ;;  %v1482_v14 = vld [vmem:[%s6269_s18 + $0x10] sm:$0xff] }
 0x4a1   :  { %v931_v19 = vpop.f32.mrb[6].mxu0 }
 0x4a2   :  { %v935_v21 = vmul.f32 %v931_v19, %v619_v16  ;;  %v4265_v22 = vpop.f32.mrb[7].mxu0  ;;  %v1484_v19 = vld [vmem:[%s6269_s18 + $0x20] sm:$0xff] }
 0x4a3   :  { %v1486_v22 = vld [vmem:[%s6269_s18 + $0x30] sm:$0xff] }
 0x4a4   :  { %v936_v23 = vadd.f32 %v935_v21, %v859_v20  ;;  %v1485_v20 = vld [vmem:[%s6269_s18 + $0x28] sm:$0xff] }
 0x4a5   :  { %v4687_v21 = vpack.c.bf16 %v1485_v20, %v1484_v19  ;;  %v3870_v20 = vld [vmem:[%s6318_s9 + $0x20] sm:$0xff] }
 0x4a9   :  { %v1082_v24 = vpop.f32.mrb[8].mxu0 }
 0x4aa   :  { %v1086_v25 = vmax.f32 %v1008_v2, %v1082_v24  ;;  %v4287_v26 = vpop.f32.mrb[9].mxu0 }
 0x4ab   :  { %v1489_v26 = vld [vmem:[%s6269_s18 + $0x48] sm:$0xff] }
 0x4ac   :  { %v1087_v27 = vsub.f32 %v1008_v2, %v1086_v25  ;;  %v1090_v30 = vsub.f32 %v1082_v24, %v1086_v25  ;;  %v1488_v25 = vld [vmem:[%s6269_s18 + $0x40] sm:$0xff] }
 0x4ae   :  { %v1088_v31 = vmul.f32 1.442695, %v1087_v27  ;;  %v1091_v32 = vmul.f32 1.442695, %v1090_v30  ;;  %v4695_v27 = vpack.c.bf16 %v1489_v26, %v1488_v25  ;;  %v1490_v30 = vld [vmem:[%s6269_s18 + $0x50] sm:$0xff]  ;;  %v3877_v26 = vld [vmem:[%s6319_s3 + $0x20] sm:$0xff] }
 0x4b0   :  { %4927 = vpow2.f32 %v1088_v31  ;;  %v1491_v31 = vld [vmem:[%s6269_s18 + $0x58] sm:$0xff] }
 0x4b1   :  { %4929 = vpow2.f32 %v1091_v32  ;;  %v4699_v32 = vpack.c.bf16 %v1491_v31, %v1490_v30 }
 0x4ba   :  { %v4928_v34 = vpop.eup %4927 }
 0x4bb   :  { %v4930_v35 = vpop.eup %4929 }
 0x4bc   :  { %v1093_v38 = vadd.f32 %v4930_v35, %v4928_v34 }
 0x4be   :  { %4931 = vrcp.f32 %v1093_v38 }
 0x4c8   :  { %v4932_v39 = vpop.eup %4931 }
 0x4c9   :  { %v1095_v40 = vmul.f32 %v4932_v39, %v4928_v34  ;;  %v1171_v41 = vmul.f32 %v4932_v39, %v4930_v35  ;;  %v1492_v34 = vld [vmem:[%s6269_s18 + $0x60] sm:$0xff]  ;;  %v1493_v35 = vld [vmem:[%s6269_s18 + $0x68] sm:$0xff] }
 0x4ca   :  { %v4703_v38 = vpack.c.bf16 %v1493_v35, %v1492_v34 }
 0x4cb   :  { %4291 = vmatmul.mubr.msk.f32.vlgmr.msra.gmra.mrb[10].mxu1 %vm781_vm4, %v1095_v40  ;;  %4296 = vmatmul.mubr.msk.f32.vlgmr.msra.gmra.mrb[10].mxu0 %vm781_vm4, %v1171_v41 }
 0x4cc   :  { %4306 = vmatprep.mubr.msk.f32.mxu1 %vm368_vm1, %v936_v23  ;;  %4666 = vmatpush3.bf16.msra.mxu1 %v4663_v12  ;;  %v1480_v12 = vld [vmem:[%s6269_s18] sm:$0xff]  ;;  %v1487_v23 = vld [vmem:[%s6269_s18 + $0x38] sm:$0xff] }
 0x4cd   :  { %4668 = vmatprep.subr.bf16.mxu1 %v4667_v44  ;;  %4674 = vmatpush3.bf16.msra.mxu0 %v4671_v8  ;;  %v4679_v15 = vpack.c.bf16 %v1481_v13, %v1480_v12  ;;  %v4691_v24 = vpack.c.bf16 %v1487_v23, %v1486_v22  ;;  %v3872_v23 = vld [vmem:[%s6318_s9 + $0x30] sm:$0xff] }
 0x4ce   :  { %4676 = vmatprep.subr.bf16.mxu0 %v4675_v11 }
 0x4d0   :  { %4670 = vmatpush3.bf16.msra.mxu1 %v4667_v44 }
 0x4d1   :  { %4678 = vmatpush3.bf16.msra.mxu0 %v4675_v11  ;;  %4680 = vmatprep.subr.bf16.mxu1 %v4679_v15 }
 0x59e   :  { %v1165_v45 = vpop.f32.mrb[10].mxu1  ;;  %v1241_v46 = vpop.f32.mrb[10].mxu0 }
 0x59f   :  { %v1169_v47 = vmul.f32 %v1165_v45, %v614_v17  ;;  %v1245_v48 = vmul.f32 %v1241_v46, %v619_v16  ;;  %v4292_v49 = vpop.f32.mrb[11].mxu1  ;;  %v4297_v50 = vpop.f32.mrb[11].mxu0  ;;  %v1483_v16 = vld [vmem:[%s6269_s18 + $0x18] sm:$0xff]  ;;  %v3862_v46 = vld [vmem:[%s6323_s11] ss:$0 sm:$0xff] }
 0x5a0   :  { %v4683_v17 = vpack.c.bf16 %v1483_v16, %v1482_v14 }
 0x5a1   :  { %v1246_v51 = vadd.f32 %v1245_v48, %v1169_v47  ;;  %v3863_v48 = vld [vmem:[#allocation11] ss:$0 sm:$0xff] }
 0x5a3   :  { %4307 = vmatmul.mubr.msk.f32.vlgmr.msra.gmra.mrb[12].mxu1 %vm368_vm1, %v1246_v51 }
 0x5a4   :  { %4682 = vmatpush3.bf16.msra.mxu1 %v4679_v15 }
 0x5a5   :  { %4684 = vmatprep.subr.bf16.mxu1 %v4683_v17 }
 0x5a8   :  { %4686 = vmatpush3.bf16.msra.mxu1 %v4683_v17 }
 0x5a9   :  { %4688 = vmatprep.subr.bf16.mxu1 %v4687_v21 }
 0x5ac   :  { %4690 = vmatpush3.bf16.msra.mxu1 %v4687_v21  ;;  %v3871_v21 = vld [vmem:[%s6318_s9 + $0x28] sm:$0xff] }
 0x5ad   :  { %4692 = vmatprep.subr.bf16.mxu1 %v4691_v24  ;;  %v4711_v22 = vpack.c.bf16 %v3871_v21, %v3870_v20 }
 0x5af   :  { %4712 = vmatprep.subr.bf16.mxu0 %v4711_v22 }
 0x5b0   :  { %4694 = vmatpush3.bf16.msra.mxu1 %v4691_v24  ;;  %v3873_v24 = vld [vmem:[%s6318_s9 + $0x38] sm:$0xff]  ;;  %s3820_s9 = sshll.u32 %s5313_s0, 4  ;;  %s3821_s9 = int_to_ptr.vmem [resolvable:$true] %s3820_s9 }
 0x5b1   :  { %4696 = vmatprep.subr.bf16.mxu1 %v4695_v27  ;;  %v4715_v25 = vpack.c.bf16 %v3873_v24, %v3872_v23  ;;  %s5247_s25 = scalar_lea.vmem %s3821_s9, 32  ;;  %p5252_p7 = scmp.lt.s32.totalorder %s3821_s9, %s3821_s9 }
 0x5b2   :  { %p5248_p6 = scmp.ne.s32.totalorder %s3821_s9, %s5247_s25  ;;  %p5253_p8 = scmp.lt.s32.totalorder %s5247_s25, %s5247_s25 }
 0x5b4   :  { %4698 = vmatpush3.bf16.msra.mxu1 %v4695_v27  ;;  %v3878_v27 = vld [vmem:[%s6319_s3 + $0x28] sm:$0xff]  ;;  %p5254_p9 = por %p5253_p8, %p5252_p7 }
 0x5b5   :  { %4700 = vmatprep.subr.bf16.mxu1 %v4699_v32  ;;  %v4719_v30 = vpack.c.bf16 %v3878_v27, %v3877_v26 }
 0x5b6   :  { %p5255_p10 = pnand %p5254_p9, %p5248_p6 }
 0x5b8   :  { %4702 = vmatpush3.bf16.msra.mxu1 %v4699_v32 }
 0x5b9   :  { %4704 = vmatprep.subr.bf16.mxu1 %v4703_v38 }
 0x5bc   :  { %4706 = vmatpush3.bf16.msra.mxu1 %v4703_v38 }
 0x676   :  { %v4308_v53 = vpop.f32.mrb[12].mxu1 }
 0x677   :  { %v1330_v54 = vpop.f32.mrb[13].mxu1  ;;  %v1336_v55 = vadd.f32 %v4308_v53, %v3859_v52 }
 0x678   :  { %v1331_v57 = vadd.f32 %v3859_v52, %v1330_v54 }
 0x679   :  { %v1340_v60 = vadd.f32 %v1336_v55, %v5690_v29  ;;  %v1494_v55 = vld [vmem:[%s6269_s18 + $0x70] sm:$0xff] }
 0x67a   :  { %v1339_v58 = vadd.f32 %v1331_v57, %v5688_v28  ;;  %v1495_v57 = vld [vmem:[%s6269_s18 + $0x78] sm:$0xff] }
 0x67b   :  { %v1346_v61 = vsel %vm368_vm1, %v1340_v60, 0.0 }
 0x67c   :  { %v1343_v59 = vsel %vm368_vm1, %v1339_v58, 0.0 }
 0x67d   :  { %1344 = vadd.xlane.f32.xlu0 %v1343_v59  ;;  %v3864_v59 = vld [vmem:[#allocation14] ss:$0 sm:$0xff] }
 0x681   :  { %1347 = vadd.xlane.f32.xlu0 %v1346_v61 }
 0x70a   :  { %v1345_v62 = vpop.xlane.xlu0 %1344 }
 0x70b   :  { %v1350_v63 = vmul.f32 0.03125, %v1345_v62 }
 0x70d   :  { %v5791_v0 = vsub.f32 %v1339_v58, %v1350_v63  ;;  %v4707_v58 = vpack.c.bf16 %v1495_v57, %v1494_v55  ;;  %v3886_v57 = vld [vmem:[%s6320_s13 + $0x30] sm:$0xff] }
 0x70e   :  { %v1348_v1 = vpop.xlane.xlu0 %1347 }
 0x70f   :  { %v1351_v2 = vmul.f32 0.03125, %v1348_v1  ;;  %v1354_v3 = vmul.f32 %v5791_v0, %v5791_v0  ;;  %4708 = vmatprep.subr.bf16.mxu1 %v4707_v58 }
 0x710   :  { %4710 = vmatpush3.bf16.msra.mxu1 %v4707_v58  ;;  %v3887_v58 = vld [vmem:[%s6320_s13 + $0x38] sm:$0xff] }
 0x711   :  { %v5795_v4 = vsub.f32 %v1340_v60, %v1351_v2  ;;  %v1356_v28 = vsel %vm368_vm1, %v1354_v3, 0.0  ;;  %4741 = vmatprep.subr.bf16.mxu1 %v5302_v18  ;;  %v3867_v2 = vld [vmem:[#allocation16] ss:$0 sm:$0xff] }
 0x712   :  { %1357 = vadd.xlane.f32.xlu1 %v1356_v28 }
 0x713   :  { %v1355_v29 = vmul.f32 %v5795_v4, %v5795_v4 }
 0x715   :  { %v1359_v5 = vsel %vm368_vm1, %v1355_v29, 0.0 }
 0x716   :  { %1360 = vadd.xlane.f32.xlu1 %v1359_v5 }
 0x79f   :  { %v1358_v39 = vpop.xlane.xlu1 %1357 }
 0x7a0   :  { %v1362_v40 = vmul.f32 0.03125, %v1358_v39 }
 0x7a2   :  { %v1364_v41 = vadd.f32 1e-05, %v1362_v40 }
 0x7a3   :  { %v1361_v42 = vpop.xlane.xlu1 %1360 }
 0x7a4   :  { %4933 = vrsqrt.f32 %v1364_v41  ;;  %v1363_v43 = vmul.f32 0.03125, %v1361_v42  ;;  %v3868_v41 = vld [vmem:[%s6265_s14] ss:$0 sm:$0xff] }
 0x7a6   :  { %v1365_v44 = vadd.f32 1e-05, %v1363_v43 }
 0x7a8   :  { %4935 = vrsqrt.f32 %v1365_v44 }
 0x7ae   :  { %v4934_v45 = vpop.eup %4933 }
 0x7af   :  { %v1368_v47 = vmul.f32 %v4934_v45, %v5791_v0  ;;  %v3869_v45 = vld [vmem:[%s6266_s15] ss:$0 sm:$0xff] }
 0x7b1   :  { %v1376_v49 = vmul.f32 %v3862_v46, %v1368_v47 }
 0x7b2   :  { %v4936_v50 = vpop.eup %4935 }
 0x7b3   :  { %v1369_v51 = vmul.f32 %v4936_v50, %v5795_v4  ;;  %v1384_v52 = vadd.f32 %v3863_v48, %v1376_v49  ;;  %v3880_v49 = vld [vmem:[%s6319_s3 + $0x38] sm:$0xff] }
 0x7b5   :  { %v1377_v53 = vmul.f32 %v3862_v46, %v1369_v51  ;;  %4317 = vmatprep.mubr.msk.f32.mxu0 %vm368_vm1, %v1384_v52 }
 0x7b7   :  { %v1385_v54 = vadd.f32 %v3863_v48, %v1377_v53  ;;  %v3879_v48 = vld [vmem:[%s6319_s3 + $0x30] sm:$0xff]  ;;  %v3884_v53 = vld [vmem:[%s6320_s13 + $0x20] sm:$0xff] }
 0x7b9   :  { %4318 = vmatmul.mubr.msk.f32.vlgmr.msra.gmra.mrb[12].mxu0 %vm368_vm1, %v1385_v54 }
 0x7ba   :  { %4714 = vmatpush3.bf16.msra.mxu0 %v4711_v22 }
 0x7bb   :  { %4716 = vmatprep.subr.bf16.mxu0 %v4715_v25 }
 0x7be   :  { %4718 = vmatpush3.bf16.msra.mxu0 %v4715_v25 }
 0x7bf   :  { %4720 = vmatprep.subr.bf16.mxu0 %v4719_v30 }
 0x88c   :  { %v4319_v60 = vpop.f32.mrb[12].mxu0 }
 0x88d   :  { %v1475_v61 = vadd.f32 %v4319_v60, %v3864_v59  ;;  %v1469_v62 = vpop.f32.mrb[13].mxu0 }
 0x88e   :  { %v1470_v63 = vadd.f32 %v3864_v59, %v1469_v62  ;;  %v4731_v59 = vpack.c.bf16 %v3887_v58, %v3886_v57  ;;  %v3874_v62 = vld [vmem:[#allocation5 + $0x1] ss:$0 sm:$0xff] }
 0x88f   :  { %v1479_v1 = vmax.f32 %v1475_v61, 0.0 }
 0x890   :  { %v1478_v0 = vmax.f32 %v1470_v63, 0.0 }
 0x892   :  { %4352 = vmatprep.mubr.f32.mxu1 %v1478_v0 }
 0x893   :  { %4353 = vmatmul.mubr.f32.vlgmr.msra.gmra.mrb[14].mxu1 %v1479_v1  ;;  %v3881_v1 = vld [vmem:[#allocation7 + $0x1] ss:$0 sm:$0xff] }
 0x894   :  { %4743 = vmatpush3.bf16.msra.mxu1 %v5711_v33  ;;  %4407 = vmatprep.mubr.msk.f32.mxu1 %vm5303_vm2, %v5304_v37 }
 0x895   :  { %4744 = vmatprep.subr.bf16.mxu1 %v5302_v18 }
 0x898   :  { %4746 = vmatpush3.bf16.msra.mxu1 %v5723_v36 }
 0x899   :  { %4747 = vmatprep.subr.bf16.mxu1 %v5302_v18 }
 0x966   :  { %v4354_v3 = vpop.f32.mrb[14].mxu1 }
 0x967   :  { %v1575_v4 = vadd.f32 %v4354_v3, %v3867_v2  ;;  %v1569_v28 = vpop.f32.mrb[15].mxu1 }
 0x968   :  { %v1570_v29 = vadd.f32 %v3867_v2, %v1569_v28 }
 0x969   :  { %v1579_v5 = vadd.f32 %v1575_v4, %v1385_v54  ;;  %v3885_v54 = vld [vmem:[%s6320_s13 + $0x28] sm:$0xff] }
 0x96a   :  { %v1578_v6 = vadd.f32 %v1570_v29, %v1384_v52  ;;  %v4723_v52 = vpack.c.bf16 %v3880_v49, %v3879_v48  ;;  %v4727_v55 = vpack.c.bf16 %v3885_v54, %v3884_v53 }
 0x96b   :  { %v1585_v7 = vsel %vm368_vm1, %v1579_v5, 0.0 }
 0x96c   :  { %1586 = vadd.xlane.f32.xlu1 %v1585_v7  ;;  %v1582_v8 = vsel %vm368_vm1, %v1578_v6, 0.0 }
 0x96d   :  { %1583 = vadd.xlane.f32.xlu0 %v1582_v8 }
 0x9f9   :  { %v1587_v9 = vpop.xlane.xlu1 %1586 }
 0x9fa   :  { %v1589_v10 = vmul.f32 0.03125, %v1587_v9  ;;  %v1584_v11 = vpop.xlane.xlu0 %1583 }
 0x9fb   :  { %v1588_v12 = vmul.f32 0.03125, %v1584_v11 }
 0x9fc   :  { %v1591_v13 = vsub.f32 %v1579_v5, %v1589_v10 }
 0x9fd   :  { %v1590_v14 = vsub.f32 %v1578_v6, %v1588_v12 }
 0x9fe   :  { %v1593_v15 = vmul.f32 %v1591_v13, %v1591_v13 }
 0x9ff   :  { %v1592_v16 = vmul.f32 %v1590_v14, %v1590_v14 }
 0xa00   :  { %v1597_v17 = vsel %vm368_vm1, %v1593_v15, 0.0 }
 0xa01   :  { %1598 = vadd.xlane.f32.xlu1 %v1597_v17  ;;  %v1594_v19 = vsel %vm368_vm1, %v1592_v16, 0.0 }
 0xa02   :  { %1595 = vadd.xlane.f32.xlu0 %v1594_v19 }
 0xa8e   :  { %v1599_v31 = vpop.xlane.xlu1 %1598 }
 0xa8f   :  { %v1601_v32 = vmul.f32 0.03125, %v1599_v31  ;;  %v1596_v34 = vpop.xlane.xlu0 %1595 }
 0xa90   :  { %v1600_v35 = vmul.f32 0.03125, %v1596_v34 }
 0xa91   :  { %v1603_v38 = vadd.f32 1e-05, %v1601_v32  ;;  %v3904_v32 = vld [vmem:[%s6322_s16 + $0x28] sm:$0xff] }
 0xa92   :  { %v1602_v39 = vadd.f32 1e-05, %v1600_v35 }
 0xa93   :  { %4937 = vrsqrt.f32 %v1603_v38 }
 0xa94   :  { %4939 = vrsqrt.f32 %v1602_v39 }
 0xa9d   :  { %v4938_v40 = vpop.eup %4937 }
 0xa9e   :  { %v4940_v42 = vpop.eup %4939  ;;  %v1607_v43 = vmul.f32 %v4938_v40, %v1591_v13 }
 0xa9f   :  { %v1606_v44 = vmul.f32 %v4940_v42, %v1590_v14 }
 0xaa0   :  { %v1615_v46 = vmul.f32 %v3868_v41, %v1607_v43 }
 0xaa1   :  { %v1614_v47 = vmul.f32 %v3868_v41, %v1606_v44 }
 0xaa2   :  { %v5899_v51 = vadd.f32 %v3869_v45, %v1615_v46 }
 0xaa3   :  { %v5897_v50 = vadd.f32 %v3869_v45, %v1614_v47 }
 0xaa5   :  { %4363 = vmatprep.mubr.msk.f32.mxu0 %vm368_vm1, %v5897_v50 }
 0xaa6   :  { %4364 = vmatmul.mubr.msk.f32.vlgmr.msra.gmra.mrb[14].mxu0 %vm368_vm1, %v5899_v51 }
 0xaa7   :  { %4722 = vmatpush3.bf16.msra.mxu0 %v4719_v30  ;;  %4374 = vmatprep.mubr.msk.f32.mxu0 %vm368_vm1, %v5897_v50 }
 0xaa8   :  { %4724 = vmatprep.subr.bf16.mxu0 %v4723_v52 }
 0xaab   :  { %4726 = vmatpush3.bf16.msra.mxu0 %v4723_v52 }
 0xaac   :  { %4728 = vmatprep.subr.bf16.mxu0 %v4727_v55 }
 0xaae   :  { %4375 = vmatmul.mubr.msk.f32.vlgmr.msra.gmra.mrb[16].mxu0 %vm368_vm1, %v5899_v51 }
 0xaaf   :  { %4730 = vmatpush3.bf16.msra.mxu0 %v4727_v55  ;;  %4385 = vmatprep.mubr.msk.f32.mxu0 %vm368_vm1, %v5897_v50 }
 0xab0   :  { %4732 = vmatprep.subr.bf16.mxu0 %v4731_v59 }
 0xab3   :  { %4734 = vmatpush3.bf16.msra.mxu0 %v4731_v59 }
 0xab4   :  { %4735 = vmatprep.subr.bf16.mxu0 %v5302_v18 }
 0xab6   :  { %4386 = vmatmul.mubr.msk.f32.vlgmr.msra.gmra.mrb[18].mxu0 %vm368_vm1, %v5899_v51 }
 0xab7   :  { %4737 = vmatpush3.bf16.msra.mxu0 %v5711_v33  ;;  %4396 = vmatprep.mubr.msk.f32.mxu0 %vm5303_vm2, %v5304_v37 }
 0xab8   :  { %4738 = vmatprep.subr.bf16.mxu0 %v5302_v18 }
 0xabb   :  { %4740 = vmatpush3.bf16.msra.mxu0 %v5723_v36 }
 0xabc   :  { %4410 = vmatprep.subr.mxu0 %v5304_v37 }
 0xb79   :  { %v4365_v60 = vpop.f32.mrb[14].mxu0 }
 0xb7a   :  { %v1709_v61 = vpop.f32.mrb[15].mxu0  ;;  %v1715_v63 = vadd.f32 %v4365_v60, %v3874_v62 }
 0xb7b   :  { %v1710_v0 = vadd.f32 %v3874_v62, %v1709_v61  ;;  %v3905_v61 = vld [vmem:[%s6322_s16 + $0x30] sm:$0xff]  ;;  %v3906_v62 = vld [vmem:[%s6322_s16 + $0x38] sm:$0xff] }
 0xb7c   :  { %v2204_v3 = vmul.f32 0.35355338, %v1715_v63  ;;  %v4763_v63 = vpack.c.bf16 %v3906_v62, %v3905_v61  ;;  %v3911_v62 = vld [vmem:[%s6323_s11 + $0x1] ss:$0 sm:$0xff] }
 0xb7d   :  { %v1894_v4 = vmul.f32 0.35355338, %v1710_v0 }
 0xb81   :  { %v4376_v2 = vpop.f32.mrb[16].mxu0 }
 0xb82   :  { %v1803_v28 = vadd.f32 %v4376_v2, %v3881_v1  ;;  %v1797_v29 = vpop.f32.mrb[17].mxu0 }
 0xb83   :  { %v1798_v5 = vadd.f32 %v3881_v1, %v1797_v29 }
 0xb84   :  { %v1969_v6 = vmul.f32 %v1894_v4, %v1803_v28  ;;  %v2279_v7 = vmul.f32 %v2204_v3, %v1803_v28 }
 0xb85   :  { %v1895_v8 = vmul.f32 %v1894_v4, %v1798_v5  ;;  %v2205_v9 = vmul.f32 %v2204_v3, %v1798_v5  ;;  %v3907_v5 = vld [vmem:[#allocation10 + $0x1] ss:$0 sm:$0xff] }
 0xb86   :  { %4408 = vmatmul.mubr.msk.f32.vlgmr.msra.gmra.mrb[16].mxu1 %vm368_vm1, %v1969_v6 }
 0xb87   :  { %4749 = vmatpush3.bf16.msra.mxu1 %v5711_v33  ;;  %4397 = vmatmul.mubr.msk.f32.vlgmr.msra.gmra.mrb[20].mxu0 %vm368_vm1, %v1895_v8 }
 0xb88   :  { %4750 = vmatprep.subr.bf16.mxu1 %v5302_v18  ;;  %4428 = vmatprep.mubr.msk.f32.mxu1 %vm5303_vm2, %v5304_v37 }
 0xb89   :  { %v4387_v10 = vpop.f32.mrb[18].mxu0  ;;  %4411 = vmatpush3.msk.msra.mxu0 %vm785_vm3, %v5746_v56  ;;  %4412 = vmatprep.mubr.msk.f32.mxu0 %vm5303_vm2, %v5304_v37 }
 0xb8a   :  { %v1885_v11 = vpop.f32.mrb[19].mxu0  ;;  %4415 = vmatprep.subr.mxu0 %v5304_v37 }
 0xb8b   :  { %4752 = vmatpush3.bf16.msra.mxu1 %v5723_v36 }
 0xb8c   :  { %4442 = vmatprep.subr.mxu1 %v5304_v37 }
 0xb8e   :  { %4429 = vmatmul.mubr.msk.f32.vlgmr.msra.gmra.mrb[18].mxu1 %vm368_vm1, %v2205_v9 }
 0xb8f   :  { %4443 = vmatpush3.msk.msra.mxu1 %vm785_vm3, %v5746_v56  ;;  %4444 = vmatprep.mubr.msk.f32.mxu1 %vm5303_vm2, %v5304_v37 }
 0xc59   :  { %v2039_v12 = vpop.f32.mrb[16].mxu1 }
 0xc5a   :  { %v1965_v13 = vpop.f32.mrb[20].mxu0  ;;  %v4409_v14 = vpop.f32.mrb[17].mxu1 }
 0xc5b   :  { %v2043_v15 = vmax.f32 %v1965_v13, %v2039_v12  ;;  %v4398_v16 = vpop.f32.mrb[21].mxu0 }
 0xc5d   :  { %v2044_v17 = vsub.f32 %v1965_v13, %v2043_v15  ;;  %v2047_v19 = vsub.f32 %v2039_v12, %v2043_v15 }
 0xc5f   :  { %v2045_v20 = vmul.f32 1.442695, %v2044_v17  ;;  %v2048_v21 = vmul.f32 1.442695, %v2047_v19 }
 0xc61   :  { %4941 = vpow2.f32 %v2045_v20  ;;  %v2275_v22 = vpop.f32.mrb[18].mxu1 }
 0xc62   :  { %4943 = vpow2.f32 %v2048_v21  ;;  %v4430_v23 = vpop.f32.mrb[19].mxu1 }
 0xc63   :  { %v2657_v23 = vld [vmem:[#allocation13 + $0x20] sm:$0xff] }
 0xc6b   :  { %v4942_v24 = vpop.eup %4941 }
 0xc6c   :  { %v4944_v25 = vpop.eup %4943 }
 0xc6d   :  { %v2050_v26 = vadd.f32 %v4944_v25, %v4942_v24 }
 0xc6f   :  { %4945 = vrcp.f32 %v2050_v26  ;;  %v2659_v26 = vld [vmem:[#allocation13 + $0x30] sm:$0xff] }
 0xc79   :  { %v4946_v27 = vpop.eup %4945 }
 0xc7a   :  { %v2052_v30 = vmul.f32 %v4946_v27, %v4942_v24  ;;  %v2128_v31 = vmul.f32 %v4946_v27, %v4944_v25  ;;  %v2658_v24 = vld [vmem:[#allocation13 + $0x28] sm:$0xff]  ;;  %v2660_v27 = vld [vmem:[#allocation13 + $0x38] sm:$0xff] }
 0xc7b   :  { %v4767_v25 = vpack.c.bf16 %v2658_v24, %v2657_v23 }
 0xc7c   :  { %4413 = vmatmul.mubr.msk.f32.vlgmr.msra.gmra.mrb[22].mxu0 %vm781_vm4, %v2052_v30  ;;  %v4771_v30 = vpack.c.bf16 %v2660_v27, %v2659_v26 }
 0xc7d   :  { %4416 = vmatpush3.msk.msra.mxu0 %vm785_vm3, %v5746_v56  ;;  %4417 = vmatprep.mubr.msk.f32.mxu0 %vm5303_vm2, %v5304_v37 }
 0xc7e   :  { %4753 = vmatprep.subr.bf16.mxu0 %v5302_v18 }
 0xc80   :  { %4418 = vmatmul.mubr.msk.f32.vlgmr.msra.gmra.mrb[24].mxu0 %vm781_vm4, %v2128_v31  ;;  %v3916_v31 = vld [vmem:[%s6269_s18 + $0x80] sm:$0xff] }
 0xc81   :  { %4755 = vmatpush3.bf16.msra.mxu0 %v5711_v33  ;;  %4439 = vmatprep.mubr.msk.f32.mxu0 %vm5303_vm2, %v5304_v37  ;;  %v3903_v33 = vld [vmem:[%s6322_s16 + $0x20] sm:$0xff] }
 0xc82   :  { %4756 = vmatprep.subr.bf16.mxu0 %v5302_v18  ;;  %v4759_v34 = vpack.c.bf16 %v3904_v32, %v3903_v33  ;;  %v3917_v33 = vld [vmem:[%s6269_s18 + $0x88] sm:$0xff]  ;;  %v3918_v32 = vld [vmem:[%s6269_s18 + $0x90] sm:$0xff] }
 0xc84   :  { %4760 = vmatprep.subr.bf16.mxu1 %v4759_v34 }
 0xc85   :  { %4758 = vmatpush3.bf16.msra.mxu0 %v5723_v36  ;;  %v3888_v36 = vld [vmem:[#allocation8 + $0x1] ss:$0 sm:$0xff] }
 0xc86   :  { %4447 = vmatprep.subr.mxu0 %v5304_v37  ;;  %v1891_v39 = vadd.f32 %v4387_v10, %v3888_v36  ;;  %v1886_v40 = vadd.f32 %v3888_v36, %v1885_v11  ;;  %v3919_v36 = vld [vmem:[%s6269_s18 + $0x98] sm:$0xff] }
 0xc88   :  { %4440 = vmatmul.mubr.msk.f32.vlgmr.msra.gmra.mrb[26].mxu0 %vm368_vm1, %v2279_v7 }
 0xc89   :  { %4448 = vmatpush3.msk.msra.mxu0 %vm785_vm3, %v5746_v56  ;;  %4449 = vmatprep.mubr.msk.f32.mxu0 %vm5303_vm2, %v5304_v37 }
 0xc8a   :  { %4768 = vmatprep.subr.bf16.mxu0 %v4767_v25 }
 0xd4f   :  { %v2122_v35 = vpop.f32.mrb[22].mxu0 }
 0xd50   :  { %v4414_v38 = vpop.f32.mrb[23].mxu0  ;;  %v2126_v56 = vmul.f32 %v2122_v35, %v1886_v40  ;;  %v4779_v35 = vpack.c.bf16 %v3919_v36, %v3918_v32  ;;  %v2902_v36 = vld [vmem:[%s6275_s24] sm:$0xff] }
 0xd51   :  { %v3920_v38 = vld [vmem:[%s6269_s18 + $0xa0] sm:$0xff] }
 0xd53   :  { %v2198_v41 = vpop.f32.mrb[24].mxu0 }
 0xd54   :  { %v2202_v42 = vmul.f32 %v2198_v41, %v1891_v39  ;;  %v4419_v43 = vpop.f32.mrb[25].mxu0  ;;  %v3922_v41 = vld [vmem:[%s6269_s18 + $0xb0] sm:$0xff] }
 0xd55   :  { %v3924_v43 = vld [vmem:[%s6269_s18 + $0xc0] sm:$0xff] }
 0xd56   :  { %v2203_v44 = vadd.f32 %v2202_v42, %v2126_v56  ;;  %v3923_v56 = vld [vmem:[%s6269_s18 + $0xb8] sm:$0xff] }
 0xd57   :  { %v4787_v42 = vpack.c.bf16 %v3923_v56, %v3922_v41  ;;  %v2904_v56 = vld [vmem:[%s6275_s24 + $0x10] sm:$0xff] }
 0xd5b   :  { %v2349_v45 = vpop.f32.mrb[26].mxu0 }
 0xd5c   :  { %v2353_v46 = vmax.f32 %v2275_v22, %v2349_v45  ;;  %v4441_v47 = vpop.f32.mrb[27].mxu0 }
 0xd5d   :  { %v3927_v47 = vld [vmem:[%s6269_s18 + $0xd8] sm:$0xff] }
 0xd5e   :  { %v2354_v48 = vsub.f32 %v2275_v22, %v2353_v46  ;;  %v2357_v49 = vsub.f32 %v2349_v45, %v2353_v46  ;;  %v3926_v46 = vld [vmem:[%s6269_s18 + $0xd0] sm:$0xff] }
 0xd60   :  { %v2355_v52 = vmul.f32 1.442695, %v2354_v48  ;;  %v2358_v53 = vmul.f32 1.442695, %v2357_v49  ;;  %v4795_v48 = vpack.c.bf16 %v3927_v47, %v3926_v46  ;;  %v3928_v49 = vld [vmem:[%s6269_s18 + $0xe0] sm:$0xff] }
 0xd61   :  { %v3939_v47 = vld [vmem:[%s6275_s24 + $0x20] sm:$0xff] }
 0xd62   :  { %4947 = vpow2.f32 %v2355_v52  ;;  %v3929_v52 = vld [vmem:[%s6269_s18 + $0xe8] sm:$0xff] }
 0xd63   :  { %4949 = vpow2.f32 %v2358_v53  ;;  %v4799_v53 = vpack.c.bf16 %v3929_v52, %v3928_v49  ;;  %v3969_v49 = vld [vmem:[%s6275_s24 + $0xc0] sm:$0xff] }
 0xd6c   :  { %v4948_v54 = vpop.eup %4947 }
 0xd6d   :  { %v4950_v55 = vpop.eup %4949 }
 0xd6e   :  { %v2360_v57 = vadd.f32 %v4950_v55, %v4948_v54 }
 0xd70   :  { %4951 = vrcp.f32 %v2360_v57 }
 0xd7a   :  { %v4952_v58 = vpop.eup %4951 }
 0xd7b   :  { %v2362_v59 = vmul.f32 %v4952_v58, %v4948_v54  ;;  %v2438_v60 = vmul.f32 %v4952_v58, %v4950_v55 }
 0xd7d   :  { %4445 = vmatmul.mubr.msk.f32.vlgmr.msra.gmra.mrb[20].mxu1 %vm781_vm4, %v2362_v59  ;;  %4450 = vmatmul.mubr.msk.f32.vlgmr.msra.gmra.mrb[28].mxu0 %vm781_vm4, %v2438_v60 }
 0xd7e   :  { %4460 = vmatprep.mubr.msk.f32.mxu1 %vm368_vm1, %v2203_v44  ;;  %4762 = vmatpush3.bf16.msra.mxu1 %v4759_v34  ;;  %v4775_v34 = vpack.c.bf16 %v3917_v33, %v3916_v31  ;;  %v3925_v44 = vld [vmem:[%s6269_s18 + $0xc8] sm:$0xff] }
 0xd7f   :  { %4764 = vmatprep.subr.bf16.mxu1 %v4763_v63  ;;  %4770 = vmatpush3.bf16.msra.mxu0 %v4767_v25  ;;  %v4791_v45 = vpack.c.bf16 %v3925_v44, %v3924_v43  ;;  %v3959_v43 = vld [vmem:[%s6275_s24 + $0x90] sm:$0xff] }
 0xd80   :  { %4772 = vmatprep.subr.bf16.mxu0 %v4771_v30 }
 0xd82   :  { %4766 = vmatpush3.bf16.msra.mxu1 %v4763_v63 }
 0xd83   :  { %4774 = vmatpush3.bf16.msra.mxu0 %v4771_v30  ;;  %4776 = vmatprep.subr.bf16.mxu1 %v4775_v34 }
 0xe50   :  { %v2432_v0 = vpop.f32.mrb[20].mxu1  ;;  %v2508_v1 = vpop.f32.mrb[28].mxu0 }
 0xe51   :  { %v2436_v2 = vmul.f32 %v2432_v0, %v1886_v40  ;;  %v2512_v3 = vmul.f32 %v2508_v1, %v1891_v39  ;;  %v4446_v4 = vpop.f32.mrb[21].mxu1  ;;  %v4451_v28 = vpop.f32.mrb[29].mxu0  ;;  %v3921_v39 = vld [vmem:[%s6269_s18 + $0xa8] sm:$0xff] }
 0xe52   :  { %v4783_v40 = vpack.c.bf16 %v3921_v39, %v3920_v38  ;;  %v3957_v38 = vld [vmem:[%s6275_s24 + $0x80] sm:$0xff] }
 0xe53   :  { %v2513_v29 = vadd.f32 %v2512_v3, %v2436_v2  ;;  %v3912_v2 = vld [vmem:[#allocation11 + $0x1] ss:$0 sm:$0xff] }
 0xe55   :  { %4461 = vmatmul.mubr.msk.f32.vlgmr.msra.gmra.mrb[22].mxu1 %vm368_vm1, %v2513_v29 }
 0xe56   :  { %4778 = vmatpush3.bf16.msra.mxu1 %v4775_v34 }
 0xe57   :  { %4780 = vmatprep.subr.bf16.mxu1 %v4779_v35 }
 0xe5a   :  { %4782 = vmatpush3.bf16.msra.mxu1 %v4779_v35  ;;  %v2903_v35 = vld [vmem:[%s6275_s24 + $0x8] sm:$0xff] }
 0xe5b   :  { %4784 = vmatprep.subr.bf16.mxu1 %v4783_v40  ;;  %v4807_v39 = vpack.c.bf16 %v2903_v35, %v2902_v36  ;;  %v3963_v36 = vld [vmem:[%s6275_s24 + $0xa0] sm:$0xff]  ;;  %v3964_v35 = vld [vmem:[%s6275_s24 + $0xa8] sm:$0xff] }
 0xe5d   :  { %4808 = vmatprep.subr.bf16.mxu0 %v4807_v39 }
 0xe5e   :  { %4786 = vmatpush3.bf16.msra.mxu1 %v4783_v40  ;;  %v3958_v40 = vld [vmem:[%s6275_s24 + $0x88] sm:$0xff] }
 0xe5f   :  { %4788 = vmatprep.subr.bf16.mxu1 %v4787_v42  ;;  %v4839_v41 = vpack.c.bf16 %v3958_v40, %v3957_v38  ;;  %v4847_v38 = vpack.c.bf16 %v3964_v35, %v3963_v36  ;;  %v3966_v40 = vld [vmem:[%s6275_s24 + $0xb8] sm:$0xff] }
 0xe62   :  { %4790 = vmatpush3.bf16.msra.mxu1 %v4787_v42  ;;  %v2905_v42 = vld [vmem:[%s6275_s24 + $0x18] sm:$0xff] }
 0xe63   :  { %4792 = vmatprep.subr.bf16.mxu1 %v4791_v45  ;;  %v4811_v44 = vpack.c.bf16 %v2905_v42, %v2904_v56  ;;  %v3975_v56 = vld [vmem:[%s6275_s24 + $0xe0] sm:$0xff]  ;;  %v3976_v42 = vld [vmem:[%s6275_s24 + $0xe8] sm:$0xff] }
 0xe66   :  { %4794 = vmatpush3.bf16.msra.mxu1 %v4791_v45  ;;  %v3960_v45 = vld [vmem:[%s6275_s24 + $0x98] sm:$0xff] }
 0xe67   :  { %4796 = vmatprep.subr.bf16.mxu1 %v4795_v48  ;;  %v4843_v46 = vpack.c.bf16 %v3960_v45, %v3959_v43  ;;  %v4863_v43 = vpack.c.bf16 %v3976_v42, %v3975_v56  ;;  %v3978_v45 = vld [vmem:[%s6275_s24 + $0xf8] sm:$0xff] }
 0xe6a   :  { %4798 = vmatpush3.bf16.msra.mxu1 %v4795_v48  ;;  %v3940_v48 = vld [vmem:[%s6275_s24 + $0x28] sm:$0xff] }
 0xe6b   :  { %4800 = vmatprep.subr.bf16.mxu1 %v4799_v53  ;;  %v6098_v52 = vpack.c.bf16 %v3940_v48, %v3939_v47  ;;  %v3728_v47 = vld [vmem:[%s6325_s22] sm:$0xff]  ;;  %v3729_v48 = vld [vmem:[%s6325_s22 + $0x8] sm:$0xff] }
 0xe6e   :  { %4802 = vmatpush3.bf16.msra.mxu1 %v4799_v53  ;;  %v3970_v53 = vld [vmem:[%s6275_s24 + $0xc8] sm:$0xff] }
 0xf28   :  { %v4462_v6 = vpop.f32.mrb[22].mxu1 }
 0xf29   :  { %v2605_v7 = vadd.f32 %v4462_v6, %v3907_v5  ;;  %v2599_v8 = vpop.f32.mrb[23].mxu1  ;;  %v3931_v6 = vld [vmem:[%s6269_s18 + $0xf8] sm:$0xff] }
 0xf2a   :  { %v2600_v9 = vadd.f32 %v3907_v5, %v2599_v8  ;;  %v3930_v5 = vld [vmem:[%s6269_s18 + $0xf0] sm:$0xff]  ;;  %v3913_v8 = vld [vmem:[#allocation14 + $0x1] ss:$0 sm:$0xff] }
 0xf2b   :  { %v2609_v10 = vadd.f32 %v2605_v7, %v5899_v51  ;;  %v4803_v7 = vpack.c.bf16 %v3931_v6, %v3930_v5 }
 0xf2c   :  { %v2608_v11 = vadd.f32 %v2600_v9, %v5897_v50 }
 0xf2d   :  { %v2617_v12 = vsel %vm368_vm1, %v2609_v10, 0.0  ;;  %4804 = vmatprep.subr.bf16.mxu1 %v4803_v7 }
 0xf2e   :  { %2618 = vadd.xlane.f32.xlu1 %v2617_v12  ;;  %v2614_v13 = vsel %vm368_vm1, %v2608_v11, 0.0  ;;  %4806 = vmatpush3.bf16.msra.mxu1 %v4803_v7  ;;  %v3935_v7 = vld [vmem:[%s6265_s14 + $0x1] ss:$0 sm:$0xff] }
 0xf2f   :  { %2615 = vadd.xlane.f32.xlu0 %v2614_v13  ;;  %4840 = vmatprep.subr.bf16.mxu1 %v4839_v41 }
 0xfbb   :  { %v2619_v14 = vpop.xlane.xlu1 %2618 }
 0xfbc   :  { %v2621_v15 = vmul.f32 0.03125, %v2619_v14  ;;  %v2616_v16 = vpop.xlane.xlu0 %2615 }
 0xfbd   :  { %v2620_v17 = vmul.f32 0.03125, %v2616_v16 }
 0xfbe   :  { %v5988_v19 = vsub.f32 %v2609_v10, %v2621_v15  ;;  %v3932_v15 = vld [vmem:[#allocation16 + $0x1] ss:$0 sm:$0xff] }
 0xfbf   :  { %v5990_v20 = vsub.f32 %v2608_v11, %v2620_v17 }
 0xfc0   :  { %v2625_v21 = vmul.f32 %v5988_v19, %v5988_v19 }
 0xfc1   :  { %v2624_v50 = vmul.f32 %v5990_v20, %v5990_v20 }
 0xfc2   :  { %v2629_v51 = vsel %vm368_vm1, %v2625_v21, 0.0 }
 0xfc3   :  { %2630 = vadd.xlane.f32.xlu1 %v2629_v51  ;;  %v2626_v22 = vsel %vm368_vm1, %v2624_v50, 0.0 }
 0xfc4   :  { %2627 = vadd.xlane.f32.xlu0 %v2626_v22 }
0x1050   :  { %v2631_v54 = vpop.xlane.xlu1 %2630 }
0x1051   :  { %v2633_v55 = vmul.f32 0.03125, %v2631_v54  ;;  %v2628_v57 = vpop.xlane.xlu0 %2627  ;;  %v6103_v54 = vpack.c.bf16 %v3970_v53, %v3969_v49  ;;  %v4875_v49 = vpack.c.bf16 %v3729_v48, %v3728_v47 }
0x1052   :  { %v2632_v58 = vmul.f32 0.03125, %v2628_v57  ;;  %v5305_v57 = vmov 0  }
0x1053   :  { %v2635_v59 = vadd.f32 1e-05, %v2633_v55  ;;  %v2901_v55 = vld [vmem:[%s6324_s7 + $0x8] sm:$0xff]  ;;  %4910 = vset.pattern.permute.xlu1 %v5305_v57  ;;  %4909 = vset.pattern.permute.xlu0 %v5305_v57 }
0x1054   :  { %v2634_v60 = vadd.f32 1e-05, %v2632_v58  ;;  %v2900_v58 = vld [vmem:[%s6324_s7] sm:$0xff] }
0x1055   :  { %4953 = vrsqrt.f32 %v2635_v59  ;;  %v5306_v59 = vmov 1  }
0x1056   :  { %4955 = vrsqrt.f32 %v2634_v60  ;;  %v5307_v60 = vmov 4  }
0x105f   :  { %v4954_v61 = vpop.eup %4953 }
0x1060   :  { %v4956_v63 = vpop.eup %4955  ;;  %v2639_v0 = vmul.f32 %v4954_v61, %v5988_v19  ;;  %v5308_v61 = vmov 6  }
0x1061   :  { %v2638_v1 = vmul.f32 %v4956_v63, %v5990_v20  ;;  %v5310_v63 = vmov 7  }
0x1062   :  { %v2647_v3 = vmul.f32 %v3911_v62, %v2639_v0  ;;  %v5311_v0 = vmov 3  }
0x1063   :  { %v2646_v4 = vmul.f32 %v3911_v62, %v2638_v1  ;;  %v5309_v62 = vmov 2   ;;  %v5312_v1 = vmov 5  }
0x1064   :  { %v2655_v29 = vadd.f32 %v3912_v2, %v2647_v3 }
0x1065   :  { %v2654_v28 = vadd.f32 %v3912_v2, %v2646_v4 }
0x1067   :  { %4471 = vmatprep.mubr.msk.f32.mxu0 %vm368_vm1, %v2654_v28 }
0x1068   :  { %4472 = vmatmul.mubr.msk.f32.vlgmr.msra.gmra.mrb[30].mxu0 %vm368_vm1, %v2655_v29 }
0x1069   :  { %4810 = vmatpush3.bf16.msra.mxu0 %v4807_v39  ;;  %v3965_v39 = vld [vmem:[%s6275_s24 + $0xb0] sm:$0xff] }
0x106a   :  { %4812 = vmatprep.subr.bf16.mxu0 %v4811_v44 }
0x106d   :  { %4814 = vmatpush3.bf16.msra.mxu0 %v4811_v44  ;;  %v3977_v44 = vld [vmem:[%s6275_s24 + $0xf0] sm:$0xff] }
0x106e   :  { %4816 = vmatprep.subr.bf16.mxu0 %v6098_v52 }
0x113b   :  { %v4473_v9 = vpop.f32.mrb[30].mxu0 }
0x113c   :  { %v2747_v10 = vadd.f32 %v4473_v9, %v3913_v8  ;;  %v2741_v11 = vpop.f32.mrb[31].mxu0 }
0x113d   :  { %v2742_v12 = vadd.f32 %v3913_v8, %v2741_v11  ;;  %v3936_v11 = vld [vmem:[%s6266_s15 + $0x1] ss:$0 sm:$0xff] }
0x113e   :  { %v2751_v14 = vmax.f32 %v2747_v10, 0.0 }
0x113f   :  { %v2750_v13 = vmax.f32 %v2742_v12, 0.0 }
0x1141   :  { %4506 = vmatprep.mubr.f32.mxu1 %v2750_v13 }
0x1142   :  { %4507 = vmatmul.mubr.f32.vlgmr.msra.gmra.mrb[24].mxu1 %v2751_v14  ;;  %v3941_v14 = vld [vmem:[%s6275_s24 + $0x30] sm:$0xff] }
0x1143   :  { %4842 = vmatpush3.bf16.msra.mxu1 %v4839_v41  ;;  %v4851_v41 = vpack.c.bf16 %v3966_v40, %v3965_v39 }
0x1144   :  { %4844 = vmatprep.subr.bf16.mxu1 %v4843_v46 }
0x1147   :  { %4846 = vmatpush3.bf16.msra.mxu1 %v4843_v46  ;;  %v4867_v46 = vpack.c.bf16 %v3978_v45, %v3977_v44 }
0x1148   :  { %4856 = vmatprep.subr.bf16.mxu1 %v6103_v54 }
0x1215   :  { %v4508_v16 = vpop.f32.mrb[24].mxu1 }
0x1216   :  { %v2849_v17 = vadd.f32 %v4508_v16, %v3932_v15  ;;  %v2843_v19 = vpop.f32.mrb[25].mxu1  ;;  %v3971_v16 = vld [vmem:[%s6275_s24 + $0xd0] sm:$0xff] }
0x1217   :  { %v2844_v20 = vadd.f32 %v3932_v15, %v2843_v19  ;;  %v3942_v15 = vld [vmem:[%s6275_s24 + $0x38] sm:$0xff] }
0x1218   :  { %v2853_v21 = vadd.f32 %v2849_v17, %v2655_v29  ;;  %v3972_v17 = vld [vmem:[%s6275_s24 + $0xd8] sm:$0xff] }
0x1219   :  { %v2852_v50 = vadd.f32 %v2844_v20, %v2654_v28 }
0x121a   :  { %v2861_v51 = vsel %vm368_vm1, %v2853_v21, 0.0 }
0x121b   :  { %2862 = vadd.xlane.f32.xlu1 %v2861_v51  ;;  %v2858_v22 = vsel %vm368_vm1, %v2852_v50, 0.0  ;;  %v3945_v51 = vld [vmem:[%s6275_s24 + $0x40] sm:$0xff] }
0x121c   :  { %2859 = vadd.xlane.f32.xlu0 %v2858_v22  ;;  %v3946_v22 = vld [vmem:[%s6275_s24 + $0x48] sm:$0xff] }
0x12a8   :  { %v2863_v23 = vpop.xlane.xlu1 %2862 }
0x12a9   :  { %v2865_v24 = vmul.f32 0.03125, %v2863_v23  ;;  %v2860_v25 = vpop.xlane.xlu0 %2859  ;;  %v4823_v23 = vpack.c.bf16 %v3946_v22, %v3945_v51 }
0x12aa   :  { %v2864_v26 = vmul.f32 0.03125, %v2860_v25  ;;  %v3948_v25 = vld [vmem:[%s6275_s24 + $0x58] sm:$0xff] }
0x12ab   :  { %v6055_v27 = vsub.f32 %v2853_v21, %v2865_v24  ;;  %v4819_v21 = vpack.c.bf16 %v3942_v15, %v3941_v14  ;;  %v3947_v24 = vld [vmem:[%s6275_s24 + $0x50] sm:$0xff] }
0x12ac   :  { %v6057_v30 = vsub.f32 %v2852_v50, %v2864_v26  ;;  %v4859_v50 = vpack.c.bf16 %v3972_v17, %v3971_v16  ;;  %v4827_v26 = vpack.c.bf16 %v3948_v25, %v3947_v24 }
0x12ad   :  { %v2869_v31 = vmul.f32 %v6055_v27, %v6055_v27 }
0x12ae   :  { %v2868_v33 = vmul.f32 %v6057_v30, %v6057_v30 }
0x12af   :  { %v2873_v32 = vsel %vm368_vm1, %v2869_v31, 0.0 }
0x12b0   :  { %2874 = vadd.xlane.f32.xlu1 %v2873_v32  ;;  %v2870_v34 = vsel %vm368_vm1, %v2868_v33, 0.0  ;;  %v3953_v33 = vld [vmem:[%s6275_s24 + $0x70] sm:$0xff]  ;;  %v3954_v32 = vld [vmem:[%s6275_s24 + $0x78] sm:$0xff] }
0x12b1   :  { %2871 = vadd.xlane.f32.xlu0 %v2870_v34  ;;  %v4835_v34 = vpack.c.bf16 %v3954_v32, %v3953_v33 }
0x12c1   :  { %2994 = vperm.xlu1 %4910, %v2901_v55  }
0x12c5   :  { %4911 = vset.pattern.permute.xlu1 %v5306_v59 }
0x12c6   :  { %3082 = vperm.xlu1 %4911, %v2900_v58  }
0x12c7   :  { %2989 = vperm.xlu0 %4909, %v2900_v58  }
0x12ca   :  { %3086 = vperm.xlu1 %4911, %v2901_v55  }
0x12cb   :  { %4915 = vset.pattern.permute.xlu0 %v5307_v60 }
0x12cc   :  { %3362 = vperm.xlu0 %4915, %v2901_v55  }
0x12ce   :  { %4912 = vset.pattern.permute.xlu1 %v5309_v62 }
0x12cf   :  { %3174 = vperm.xlu1 %4912, %v2900_v58  }
0x12d0   :  { %4917 = vset.pattern.permute.xlu0 %v5308_v61 }
0x12d1   :  { %3542 = vperm.xlu0 %4917, %v2900_v58  }
0x12d3   :  { %3178 = vperm.xlu1 %4912, %v2901_v55  }
0x12d5   :  { %4920 = vset.pattern.permute.xlu0 %v5310_v63 }
0x12d6   :  { %3638 = vperm.xlu0 %4920, %v2901_v55  }
0x12d7   :  { %4913 = vset.pattern.permute.xlu1 %v5311_v0 }
0x12d8   :  { %3266 = vperm.xlu1 %4913, %v2900_v58  }
0x12dc   :  { %3270 = vperm.xlu1 %4913, %v2901_v55  }
0x12e0   :  { %4914 = vset.pattern.permute.xlu1 %v5307_v60 }
0x12e1   :  { %3358 = vperm.xlu1 %4914, %v2900_v58  }
0x12e5   :  { %4916 = vset.pattern.permute.xlu1 %v5312_v1 }
0x12e6   :  { %3450 = vperm.xlu1 %4916, %v2900_v58  }
0x12ea   :  { %3454 = vperm.xlu1 %4916, %v2901_v55  }
0x12ee   :  { %4918 = vset.pattern.permute.xlu1 %v5308_v61 }
0x12ef   :  { %3546 = vperm.xlu1 %4918, %v2901_v55  }
0x12f3   :  { %4919 = vset.pattern.permute.xlu1 %v5310_v63 }
0x12f4   :  { %3634 = vperm.xlu1 %4919, %v2900_v58  }
0x133d   :  { %v2875_v2 = vpop.xlane.xlu1 %2874 }
0x133e   :  { %v2877_v3 = vmul.f32 0.03125, %v2875_v2  ;;  %v2872_v4 = vpop.xlane.xlu0 %2871 }
0x133f   :  { %v2876_v28 = vmul.f32 0.03125, %v2872_v4 }
0x1340   :  { %v2879_v29 = vadd.f32 1e-05, %v2877_v3 }
0x1341   :  { %v2878_v5 = vadd.f32 1e-05, %v2876_v28 }
0x1342   :  { %4957 = vrsqrt.f32 %v2879_v29 }
0x1343   :  { %4959 = vrsqrt.f32 %v2878_v5 }
0x1346   :  { %v2990_v63 = vpop.permute.xlu0 %2989 }
0x134b   :  { %v3363_v15 = vpop.permute.xlu0 %3362 }
0x134c   :  { %v4958_v6 = vpop.eup %4957 }
0x134d   :  { %v4960_v8 = vpop.eup %4959  ;;  %v2883_v9 = vmul.f32 %v4958_v6, %v6055_v27  ;;  %v3951_v27 = vld [vmem:[%s6275_s24 + $0x60] sm:$0xff] }
0x134e   :  { %v2882_v10 = vmul.f32 %v4960_v8, %v6057_v30  ;;  %v3952_v30 = vld [vmem:[%s6275_s24 + $0x68] sm:$0xff] }
0x134f   :  { %v2891_v12 = vmul.f32 %v3935_v7, %v2883_v9  ;;  %v4831_v31 = vpack.c.bf16 %v3952_v30, %v3951_v27 }
0x1350   :  { %v2890_v13 = vmul.f32 %v3935_v7, %v2882_v10  ;;  %v3543_v30 = vpop.permute.xlu0 %3542 }
0x1351   :  { %v6135_v20 = vadd.f32 %v3936_v11, %v2891_v12 }
0x1352   :  { %v6133_v19 = vadd.f32 %v3936_v11, %v2890_v13 }
0x1354   :  { %4517 = vmatprep.mubr.msk.f32.mxu0 %vm368_vm1, %v6133_v19  ;;  %4561 = vmatprep.mubr.msk.f32.mxu1 %vm368_vm1, %v6133_v19 }
0x1355   :  { %4518 = vmatmul.mubr.msk.f32.vlgmr.msra.gmra.mrb[32].mxu0 %vm368_vm1, %v6135_v20  ;;  %4562 = vmatmul.mubr.msk.f32.vlgmr.msra.gmra.mrb[26].mxu1 %vm368_vm1, %v6135_v20  ;;  %v3639_v40 = vpop.permute.xlu0 %3638 }
0x1356   :  { %4818 = vmatpush3.bf16.msra.mxu0 %v6098_v52  ;;  %4858 = vmatpush3.bf16.msra.mxu1 %v6103_v54  ;;  %v2995_v52 = vpop.permute.xlu1 %2994 }
0x1357   :  { %4528 = vmatprep.mubr.msk.f32.mxu0 %vm368_vm1, %v6133_v19  ;;  %4583 = vmatprep.mubr.msk.f32.mxu1 %vm368_vm1, %v6133_v19 }
0x1358   :  { %4820 = vmatprep.subr.bf16.mxu0 %v4819_v21  ;;  %4860 = vmatprep.subr.bf16.mxu1 %v4859_v50 }
0x135a   :  { %4822 = vmatpush3.bf16.msra.mxu0 %v4819_v21  ;;  %4862 = vmatpush3.bf16.msra.mxu1 %v4859_v50  ;;  %v3083_v53 = vpop.permute.xlu1 %3082 }
0x135b   :  { %4824 = vmatprep.subr.bf16.mxu0 %v4823_v23  ;;  %4871 = vmatprep.subr.bf16.mxu1 %v5302_v18 }
0x135d   :  { %4529 = vmatmul.mubr.msk.f32.vlgmr.msra.gmra.mrb[34].mxu0 %vm368_vm1, %v6135_v20  ;;  %4584 = vmatmul.mubr.msk.f32.vlgmr.msra.gmra.mrb[28].mxu1 %vm368_vm1, %v6135_v20 }
0x135e   :  { %4826 = vmatpush3.bf16.msra.mxu0 %v4823_v23  ;;  %4539 = vmatprep.mubr.msk.f32.mxu0 %vm368_vm1, %v6133_v19  ;;  %v3087_v54 = vpop.permute.xlu1 %3086 }
0x135f   :  { %4828 = vmatprep.subr.bf16.mxu0 %v4827_v26  ;;  %4601 = vmatprep.mubr.msk.f32.mxu1 %vm5303_vm2, %v5304_v37 }
0x1362   :  { %4830 = vmatpush3.bf16.msra.mxu0 %v4827_v26  ;;  %v3175_v55 = vpop.permute.xlu1 %3174 }
0x1363   :  { %4832 = vmatprep.subr.bf16.mxu0 %v4831_v31 }
0x1365   :  { %4540 = vmatmul.mubr.msk.f32.vlgmr.msra.gmra.mrb[36].mxu0 %vm368_vm1, %v6135_v20 }
0x1366   :  { %4834 = vmatpush3.bf16.msra.mxu0 %v4831_v31  ;;  %4550 = vmatprep.mubr.msk.f32.mxu0 %vm368_vm1, %v6133_v19  ;;  %v3179_v57 = vpop.permute.xlu1 %3178 }
0x1367   :  { %4836 = vmatprep.subr.bf16.mxu0 %v4835_v34 }
0x136a   :  { %4838 = vmatpush3.bf16.msra.mxu0 %v4835_v34  ;;  %v3267_v58 = vpop.permute.xlu1 %3266 }
0x136b   :  { %4848 = vmatprep.subr.bf16.mxu0 %v4847_v38 }
0x136d   :  { %4551 = vmatmul.mubr.msk.f32.vlgmr.msra.gmra.mrb[38].mxu0 %vm368_vm1, %v6135_v20 }
0x136e   :  { %4850 = vmatpush3.bf16.msra.mxu0 %v4847_v38  ;;  %4572 = vmatprep.mubr.msk.f32.mxu0 %vm368_vm1, %v6133_v19  ;;  %v3271_v62 = vpop.permute.xlu1 %3270 }
0x136f   :  { %4852 = vmatprep.subr.bf16.mxu0 %v4851_v41 }
0x1372   :  { %4854 = vmatpush3.bf16.msra.mxu0 %v4851_v41  ;;  %v3359_v7 = vpop.permute.xlu1 %3358 }
0x1373   :  { %4864 = vmatprep.subr.bf16.mxu0 %v4863_v43 }
0x1375   :  { %4573 = vmatmul.mubr.msk.f32.vlgmr.msra.gmra.mrb[40].mxu0 %vm368_vm1, %v6135_v20 }
0x1376   :  { %4866 = vmatpush3.bf16.msra.mxu0 %v4863_v43  ;;  %4594 = vmatprep.mubr.msk.f32.mxu0 %vm368_vm1, %v6133_v19  ;;  %v3451_v13 = vpop.permute.xlu1 %3450 }
0x1377   :  { %4868 = vmatprep.subr.bf16.mxu0 %v4867_v46 }
0x137a   :  { %4870 = vmatpush3.bf16.msra.mxu0 %v4867_v46 }
0x137b   :  { %4874 = vmatprep.subr.bf16.mxu0 %v5302_v18 }
0x137d   :  { %4595 = vmatmul.mubr.msk.f32.vlgmr.msra.gmra.mrb[42].mxu0 %vm368_vm1, %v6135_v20  ;;  %v3455_v20 = vpop.permute.xlu1 %3454 }
0x137e   :  { %4612 = vmatprep.mubr.msk.f32.mxu0 %vm5303_vm2, %v5304_v37  ;;  %4876 = vmatpush3.bf16.msra.mxu0 %v4875_v49  ;;  %v3645_v49 = vld [vmem:[#allocation19] sm:$0x3] }
0x137f   :  { %4877 = vmatprep.subr.bf16.mxu0 %v5302_v18 }
0x1381   :  { %v3547_v26 = vpop.permute.xlu1 %3546 }
0x1385   :  { %v3635_v56 = vpop.permute.xlu1 %3634 }
0x1428   :  { %v4519_v59 = vpop.f32.mrb[32].mxu0  ;;  %v4563_v37 = vpop.f32.mrb[26].mxu1 }
0x1429   :  { %v2978_v60 = vpop.f32.mrb[33].mxu0  ;;  %v3348_v61 = vpop.f32.mrb[27].mxu1  ;;  %v2998_v2 = vmul.f32 %v4519_v59, %v2995_v52  ;;  %v3366_v50 = vmul.f32 %v4563_v37, %v3363_v15  ;;  %v3730_v52 = vld [vmem:[%s6325_s22 + $0x10] sm:$0xff] }
0x142a   :  { %v2997_v29 = vmul.f32 %v2990_v63, %v2978_v60  ;;  %v3365_v22 = vmul.f32 %v3359_v7, %v3348_v61  ;;  %v3983_v60 = vld [vmem:[#allocation22] ss:$0 sm:$0xff] }
0x1430   :  { %v4530_v0 = vpop.f32.mrb[34].mxu0  ;;  %v4585_v1 = vpop.f32.mrb[28].mxu1 }
0x1431   :  { %v3090_v3 = vmul.f32 %v4530_v0, %v3087_v54  ;;  %v3072_v4 = vpop.f32.mrb[35].mxu0  ;;  %v3532_v28 = vpop.f32.mrb[29].mxu1  ;;  %v3550_v34 = vmul.f32 %v4585_v1, %v3547_v26 }
0x1432   :  { %v3089_v18 = vmul.f32 %v3083_v53, %v3072_v4  ;;  %v3549_v35 = vmul.f32 %v3543_v30, %v3532_v28  ;;  %v3731_v53 = vld [vmem:[%s6325_s22 + $0x18] sm:$0xff] }
0x1433   :  { %v3092_v5 = vadd.f32 %v3090_v3, %v2998_v2  ;;  %v4878_v54 = vpack.c.bf16 %v3731_v53, %v3730_v52 }
0x1434   :  { %v3091_v6 = vadd.f32 %v3089_v18, %v2997_v29 }
0x1435   :  { %4879 = vmatpush3.bf16.msra.mxu0 %v4878_v54 }
0x1438   :  { %v4541_v8 = vpop.f32.mrb[36].mxu0 }
0x1439   :  { %v3182_v9 = vmul.f32 %v4541_v8, %v3179_v57  ;;  %v3164_v10 = vpop.f32.mrb[37].mxu0 }
0x143a   :  { %v3181_v11 = vmul.f32 %v3175_v55, %v3164_v10  ;;  %v3981_v55 = vld [vmem:[#allocation20] ss:$0 sm:$0xff] }
0x143b   :  { %v3184_v12 = vadd.f32 %v3182_v9, %v3092_v5 }
0x143c   :  { %v3183_v14 = vadd.f32 %v3181_v11, %v3091_v6 }
0x1440   :  { %v4552_v16 = vpop.f32.mrb[38].mxu0 }
0x1441   :  { %v3274_v17 = vmul.f32 %v4552_v16, %v3271_v62  ;;  %v3256_v19 = vpop.f32.mrb[39].mxu0 }
0x1442   :  { %v3273_v21 = vmul.f32 %v3267_v58, %v3256_v19 }
0x1443   :  { %v3276_v51 = vadd.f32 %v3274_v17, %v3184_v12 }
0x1444   :  { %v3275_v23 = vadd.f32 %v3273_v21, %v3183_v14 }
0x1445   :  { %v3368_v24 = vadd.f32 %v3366_v50, %v3276_v51 }
0x1446   :  { %v3367_v25 = vadd.f32 %v3365_v22, %v3275_v23 }
0x1448   :  { %v4574_v27 = vpop.f32.mrb[40].mxu0 }
0x1449   :  { %v3458_v31 = vmul.f32 %v4574_v27, %v3455_v20  ;;  %v3440_v33 = vpop.f32.mrb[41].mxu0 }
0x144a   :  { %v3457_v32 = vmul.f32 %v3451_v13, %v3440_v33 }
0x144b   :  { %v3460_v36 = vadd.f32 %v3458_v31, %v3368_v24 }
0x144c   :  { %v3459_v38 = vadd.f32 %v3457_v32, %v3367_v25 }
0x144d   :  { %v3552_v39 = vadd.f32 %v3550_v34, %v3460_v36 }
0x144e   :  { %v3551_v41 = vadd.f32 %v3549_v35, %v3459_v38 }
0x1450   :  { %v4596_v42 = vpop.f32.mrb[42].mxu0 }
0x1451   :  { %v3642_v43 = vmul.f32 %v4596_v42, %v3639_v40  ;;  %v3624_v44 = vpop.f32.mrb[43].mxu0 }
0x1452   :  { %v3641_v45 = vmul.f32 %v3635_v56, %v3624_v44 }
0x1453   :  { %v3644_v46 = vadd.f32 %v3642_v43, %v3552_v39 }
0x1454   :  { %v3643_v47 = vadd.f32 %v3641_v45, %v3551_v41 }
0x1456   :  { %v4872_v48 = vpack.c.bf16 %v3644_v46, %v3643_v47 }
0x1458   :  { %4873 = vmatpush3.bf16.msra.mxu1 %v4872_v48 }
0x145b   :  { %4602 = vmatmul.mubr.msk.f32.vlgmr.msra.gmra.mrb[30].mxu1 %vm3653_vm5, %v3645_v49 }
0x152e   :  { %v3723_v57 = vpop.f32.mrb[30].mxu1 }
0x152f   :  { %v3724_v58 = vadd.f32 %v3981_v55, %v3723_v57  ;;  %v4603_v59 = vpop.f32.mrb[31].mxu1 }
0x1531   :  { %v3727_v37 = vmax.f32 %v3724_v58, 0.0 }
0x1533   :  { %4613 = vmatmul.mubr.msk.f32.vlgmr.msra.gmra.mrb[44].mxu0 %vm368_vm1, %v3727_v37 }
0x1606   :  { %v3808_v61 = vpop.f32.mrb[44].mxu0 }
0x1607   :  { %v3809_v62 = vadd.f32 %v3983_v60, %v3808_v61  ;;  %v4614_v63 = vpop.f32.mrb[45].mxu0 }
0x1609   :  { %3813 = vst.msk [vmem:[#allocation23] sm:$0x3] %vm3812_vm6, %v3809_v62 }
0x160a   :  { %5258 = shalt.err (!%p5255_p10)
}
0x160b   :  { %s6326_s7 = sld [smem:[#allocation47_spill]] }
0x1611   :  { %s5259_s11 = scalar_lea.hbm %s6326_s7, 32 }
0x1612   :  { %p5260_p11 = scmp.ne.s32.totalorder %s6326_s7, %s5259_s11  ;;  %p5263_p12 = scmp.lt.u32.totalorder %s5259_s11, %s6326_s7 }
0x1614   :  { %p5265_p13 = pnand %p5263_p12, %p5260_p11 }
0x1616   :  { %5268 = shalt.err (!%p5265_p13)
}
0x1617   :  { %3823 = dma.vmem_to_hbm [thread:$0]  %s3821_s9, 32, %s6326_s7, [#allocation4]  }
0x1618   :  { %5283 = dma.done.wait [#allocation4], 32  }
0x1619   :  { %5284 = vsyncadd [#allocation4], 4294967264 }
0x161a   :  { %3827 = vsyncpa [#allocation3], 1 }
0x161b   :  { %3828 = vsyncpa [#allocation6], 1 }
0x161c   :  { %3829 = vsyncpa [#allocation9], 1 }
0x161d   :  { %3830 = vsyncpa [#allocation12], 1 }
0x161e   :  { %3831 = vsyncpa [#allocation15], 1 }
0x161f   :  { %3832 = vsyncpa [#allocation18], 1 }
0x1620   :  { %3833 = vsyncpa [#allocation21], 1 }
0x1621   :  { %3834 = vsyncpa [#allocation4], 1 }

</bundles_post_ra>
